<compile_context>
chip_gen: v6e
topology: v6e:2x2x1
jax: 0.10.0
libtpu: 0.0.40
codegen_flags: <defaults>
</compile_context>

<pallas_src>
import functools
import numpy as np
import jax
import jax.numpy as jnp
from jax import lax
from jax.experimental import pallas as pl
from jax.experimental.pallas import tpu as pltpu

# ---------------- problem configuration (small shapes consistent with the module) --------
C_IN, C_OUT = 4, 4
CARDINALITY = 2
EXPANSION = 2
KSIZE = 3
B, H, W = 2, 16, 16

IN_CH = int(1.5 * C_IN)        # 6   (1.5 * C_in)
OUT_CH = int(1.5 * C_OUT)      # 6   (1.5 * C_out)
EXP_CH = IN_CH * EXPANSION     # 12
EXP_PAD = 16                   # EXP_CH padded to a multiple of 8 (f32 sublane tile) so the
                               # 9-tap stacked slab concatenates on aligned tile boundaries
HW = H * W                     # 256
HW4 = (H // 2) * (W // 2)      # 64
NTAPS = KSIZE * KSIZE          # 9

IMGS_PER_STEP = 2              # images folded onto the lane axis per grid step
LANES = IMGS_PER_STEP * HW     # 512
LANES4 = IMGS_PER_STEP * HW4   # 128
TAP_K = NTAPS * EXP_PAD        # 144 : contraction width of the single grouped-conv matmul

# Static per-tap spatial offsets: output pixel p reads input pixel p + oy*W + ox.
# roll semantics: rolled[p] = y[(p - shift) % LANES]  =>  shift = (-offset) % LANES.
TAP_OFFSETS = tuple((dy - KSIZE // 2) * W + (dx - KSIZE // 2)
                    for dy in range(KSIZE) for dx in range(KSIZE))
TAP_SHIFTS = tuple((-off) % LANES for off in TAP_OFFSETS)


def _silu(z):
    # z * sigmoid(z).  exp + approximate reciprocal both issue on the EUP slot.
    # Clamp the exp argument: for very negative z, exp(-z) would overflow to +inf and the
    # approximate reciprocal of inf is chip-dependent; silu(z) ~ 0 there anyway.
    e = jnp.exp(jnp.minimum(-z, 30.0))
    return z * pl.reciprocal(1.0 + e, approx=True)


# ---------------------------------- Pallas kernel ----------------------------------------
def dblock_kernel(x_ref, mask_ref, poolT_ref,
                  w1a_ref, b1a_ref, w2a_ref, b2a_ref, w3a_ref,
                  w1b_ref, b1b_ref, w2b_ref, b2b_ref, w3b_ref,
                  wc_ref, bc_ref,
                  o_ref):
    f32 = jnp.float32
    # default MXU precision; f32 accumulation via preferred_element_type
    dot = functools.partial(jnp.dot, preferred_element_type=f32)

    x = x_ref[...]                                   # (IN_CH, LANES)

    def res_block(h, w1, b1, w2cat, b2, w3):
        # 1x1 expand (+bias, SiLU).  Rows EXP_CH..EXP_PAD-1 of w1/b1 are zero, so those rows
        # of y are exactly silu(0)=0 and the stacked slab below stays 8-sublane aligned.
        y = _silu(dot(w1, h) + b1)                   # (EXP_PAD, LANES)

        # 3x3 grouped conv == ONE matmul over a K = NTAPS*EXP_PAD stacked slab.
        # Each tap slab = lane roll (XLU) + 0/1 edge mask (VPU); the mask reproduces the conv
        # zero padding and also zeroes the lanes where the cyclic roll wraps into the
        # neighbouring image / around the ends of the folded lane axis.
        slabs = []
        for t in range(NTAPS):                       # static unroll over the 3x3 taps
            if TAP_SHIFTS[t] == 0:
                slabs.append(y)                      # center tap: source always in-image
            else:
                slabs.append(pltpu.roll(y, TAP_SHIFTS[t], 1) * mask_ref[t])
        stacked = jnp.concatenate(slabs, axis=0)     # (TAP_K, LANES), tile-aligned concat
        z = _silu(dot(w2cat, stacked) + b2)          # single K=144 MXU push -> (EXP_CH, LANES)

        return h + dot(w3, z)                        # 1x1 project + residual -> (IN_CH, LANES)

    h = res_block(x, w1a_ref[...], b1a_ref[...], w2a_ref[...], b2a_ref[...], w3a_ref[...])
    h = res_block(h, w1b_ref[...], b1b_ref[...], w2b_ref[...], b2b_ref[...], w3b_ref[...])

    # bilinear x0.5 (== exact 2x2 mean for even H, W) as one lane-dense matmul with a
    # block-diagonal-per-image pooling matrix.  bf16 operands are bit-identical to default
    # MXU precision on f32 inputs (operands are rounded to bf16 anyway); accumulation is f32.
    pooled = dot(h.astype(jnp.bfloat16), poolT_ref[...])        # (IN_CH, LANES4)
    out = dot(wc_ref[...], pooled) + bc_ref[...]                 # final conv1x1 (+bias)
    o_ref[...] = out.astype(o_ref.dtype)             # (OUT_CH, LANES4) : 128-lane dense store


# ---------------------------------- wrapper ----------------------------------------------
def dblock_pallas(x_nchw, kparams, tap_masks, poolT):
    Bb = x_nchw.shape[0]
    assert Bb % IMGS_PER_STEP == 0, "pad batch to a multiple of IMGS_PER_STEP"
    grid_n = Bb // IMGS_PER_STEP

    # NCHW -> (grid, C, IMGS_PER_STEP*HW).  Tiny wrapper-side transpose (a few KiB) paid once;
    # lane-dense matmuls / stores inside the kernel dominate at these sizes.
    x_folded = (x_nchw.reshape(grid_n, IMGS_PER_STEP, IN_CH, HW)
                      .transpose(0, 2, 1, 3)
                      .reshape(grid_n, IN_CH, LANES))

    const2 = lambda g: (0, 0)
    const3 = lambda g: (0, 0, 0)

    in_specs = [
        pl.BlockSpec((None, IN_CH, LANES), lambda g: (g, 0, 0)),   # x (per-step block)
        pl.BlockSpec((NTAPS, 1, LANES), const3),                   # per-tap 0/1 edge masks
        pl.BlockSpec((LANES, LANES4), const2),                     # block-diag pool matrix (bf16)
    ]
    kernel_args = [x_folded, tap_masks, poolT]
    for blk in ("rb1", "rb2"):
        w1, b1, w2cat, b2, w3 = kparams[blk]
        in_specs += [
            pl.BlockSpec((EXP_PAD, IN_CH), const2),
            pl.BlockSpec((EXP_PAD, 1), const2),
            pl.BlockSpec((EXP_CH, TAP_K), const2),
            pl.BlockSpec((EXP_CH, 1), const2),
            pl.BlockSpec((IN_CH, EXP_CH), const2),
        ]
        kernel_args += [w1, b1, w2cat, b2, w3]
    in_specs += [pl.BlockSpec((OUT_CH, IN_CH), const2),
                 pl.BlockSpec((OUT_CH, 1), const2)]
    kernel_args += [kparams["wc"], kparams["bc"]]

    out = pl.pallas_call(
        dblock_kernel,
        out_shape=jax.ShapeDtypeStruct((grid_n, OUT_CH, LANES4), jnp.float32),
        grid=(grid_n,),
        in_specs=in_specs,
        out_specs=pl.BlockSpec((None, OUT_CH, LANES4), lambda g: (g, 0, 0)),
        compiler_params=pltpu.CompilerParams(dimension_semantics=("parallel",)),
    )(*kernel_args)

    # (grid, OUT_CH, IMGS_PER_STEP*HW4) -> NCHW
    return (out.reshape(grid_n, OUT_CH, IMGS_PER_STEP, HW4)
               .transpose(0, 2, 1, 3)
               .reshape(Bb, OUT_CH, H // 2, W // 2))


# ------------------------- glue: edge masks, pooling matrix, params ----------------------
def build_tap_masks(h, w, imgs):
    """(NTAPS, 1, imgs*h*w) 0/1 masks: tap t valid at output pixel p iff its source is
    in-image.  Tiled per image, so the roll's wrap into the neighbouring image is zeroed."""
    m = np.zeros((NTAPS, 1, h * w), np.float32)
    for dy in range(KSIZE):
        for dx in range(KSIZE):
            t = dy * KSIZE + dx
            oy, ox = dy - KSIZE // 2, dx - KSIZE // 2
            for r in range(h):
                for c in range(w):
                    if 0 <= r + oy < h and 0 <= c + ox < w:
                        m[t, 0, r * w + c] = 1.0
    return np.tile(m, (1, 1, imgs))


def build_pool_T(h, w, imgs):
    """Block-diag (imgs*HW, imgs*HW4) matrix: h_flat @ P == exact per-image 2x2 mean pool
    (== bilinear x0.5, align_corners=False) on the folded lane axis."""
    hw, hw4 = h * w, (h // 2) * (w // 2)
    P = np.zeros((hw, hw4), np.float32)
    for r in range(h // 2):
        for c in range(w // 2):
            q = r * (w // 2) + c
            for dy in range(2):
                for dx in range(2):
                    P[(2 * r + dy) * w + (2 * c + dx), q] = 0.25
    Pb = np.zeros((imgs * hw, imgs * hw4), np.float32)
    for i in range(imgs):
        Pb[i * hw:(i + 1) * hw, i * hw4:(i + 1) * hw4] = P
    return Pb


def init_params(key):
    """Deterministic synthetic init (PyTorch-layout OIHW weights)."""
    ks = jax.random.split(key, 12)

    def nrm(k, shape, fan_in, gain=1.0):
        return (gain / np.sqrt(fan_in)) * jax.random.normal(k, shape, dtype=jnp.float32)

    def res_block_params(kk):
        kW1, kb1, kW2, kb2, kW3 = kk
        W1 = nrm(kW1, (EXP_CH, IN_CH, 1, 1), IN_CH)
        b1 = 0.1 * jax.random.normal(kb1, (EXP_CH,), dtype=jnp.float32)
        W2 = nrm(kW2, (EXP_CH, EXP_CH // CARDINALITY, KSIZE, KSIZE),
                 (EXP_CH // CARDINALITY) * KSIZE * KSIZE)
        b2 = 0.1 * jax.random.normal(kb2, (EXP_CH,), dtype=jnp.float32)
        # NOTE: R3GAN zero-inits this projection; random here so the kernel is exercised.
        W3 = nrm(kW3, (IN_CH, EXP_CH, 1, 1), EXP_CH)
        return (W1, b1, W2, b2, W3)

    rb1 = res_block_params(ks[0:5])
    rb2 = res_block_params(ks[5:10])
    Wc = nrm(ks[10], (OUT_CH, IN_CH, 1, 1), IN_CH)
    bc = 0.1 * jax.random.normal(ks[11], (OUT_CH,), dtype=jnp.float32)
    return dict(rb1=rb1, rb2=rb2, Wc=Wc, bc=bc)


def to_kernel_params(tp):
    """Convert PyTorch OIHW weights to the kernel's matrix shapes (with EXP_PAD padding and
    the 9 grouped-conv taps hstacked into one (EXP_CH, NTAPS*EXP_PAD) matrix)."""
    def conv1x1_to_mat(Wo):                      # (O, I, 1, 1) -> (O, I)
        return np.asarray(Wo)[:, :, 0, 0]

    def grouped_taps_cat(W2):
        # (O, I/G, 3, 3) block-diag grouped conv -> (O, NTAPS*EXP_PAD), tap t occupies
        # columns [t*EXP_PAD, t*EXP_PAD+EXP_CH); the EXP_PAD padding columns are zero and
        # line up with the zero-padded rows of the stacked slab built in the kernel.
        W2 = np.asarray(W2)
        Cout, Cin_g, kH, kW = W2.shape
        G = CARDINALITY
        Cout_g = Cout // G
        cat = np.zeros((Cout, NTAPS * EXP_PAD), np.float32)
        for g in range(G):
            for kh in range(kH):
                for kw in range(kW):
                    t = kh * kW + kw
                    cat[g * Cout_g:(g + 1) * Cout_g,
                        t * EXP_PAD + g * Cin_g: t * EXP_PAD + (g + 1) * Cin_g] = \
                        W2[g * Cout_g:(g + 1) * Cout_g, :, kh, kw]
        return jnp.asarray(cat)

    out = {}
    for name in ("rb1", "rb2"):
        W1, b1, W2, b2, W3 = tp[name]
        W1p = np.zeros((EXP_PAD, IN_CH), np.float32)
        W1p[:EXP_CH] = conv1x1_to_mat(W1)
        b1p = np.zeros((EXP_PAD, 1), np.float32)
        b1p[:EXP_CH, 0] = np.asarray(b1)
        out[name] = (jnp.asarray(W1p), jnp.asarray(b1p), grouped_taps_cat(W2),
                     jnp.asarray(np.asarray(b2).reshape(-1, 1)),
                     jnp.asarray(conv1x1_to_mat(W3)))
    out["wc"] = jnp.asarray(conv1x1_to_mat(tp["Wc"]))
    out["bc"] = jnp.asarray(np.asarray(tp["bc"]).reshape(-1, 1))
    return out


# ---------------------------- pure-JAX reference (NCHW, like PyTorch) --------------------
def conv2d_nchw(x, w, padding=0, groups=1):
    return lax.conv_general_dilated(
        x, w, window_strides=(1, 1),
        padding=((padding, padding), (padding, padding)),
        dimension_numbers=("NCHW", "OIHW", "NCHW"),
        feature_group_count=groups,
        precision=jax.lax.Precision.HIGHEST)


def _silu_ref(z):
    return z * jax.nn.sigmoid(z)


def res_block_ref(x, p):
    W1, b1, W2, b2, W3 = p
    y = conv2d_nchw(x, W1)
    y = _silu_ref(y + b1[None, :, None, None])
    y = conv2d_nchw(y, W2, padding=KSIZE // 2, groups=CARDINALITY)
    y = _silu_ref(y + b2[None, :, None, None])
    y = conv2d_nchw(y, W3)
    return x + y


def dblock_ref(x, tp):
    x = res_block_ref(x, tp["rb1"])
    x = res_block_ref(x, tp["rb2"])
    Bb, C, Hh, Ww = x.shape
    # F.interpolate(scale_factor=0.5, bilinear, align_corners=False) == 2x2 mean (even H, W)
    x = x.reshape(Bb, C, Hh // 2, 2, Ww // 2, 2).mean(axis=(3, 5))
    return conv2d_nchw(x, tp["Wc"]) + tp["bc"][None, :, None, None]


# ---------------------------------------- main -------------------------------------------
if __name__ == "__main__":
    key = jax.random.PRNGKey(0)
    kx, kp = jax.random.split(key)
    # PyTorch-style NCHW input: (B, 1.5*C_in, H, W)
    x = jax.random.normal(kx, (B, IN_CH, H, W), dtype=jnp.float32)

    torch_params = init_params(kp)
    kparams = to_kernel_params(torch_params)
    tap_masks = jnp.asarray(build_tap_masks(H, W, IMGS_PER_STEP))
    poolT = jnp.asarray(build_pool_T(H, W, IMGS_PER_STEP), dtype=jnp.bfloat16)

    out = dblock_pallas(x, kparams, tap_masks, poolT)
    out = jax.block_until_ready(out)

    ref = jax.block_until_ready(dblock_ref(x, torch_params))
    assert out.shape == (B, OUT_CH, H // 2, W // 2), out.shape
    # Tolerance relaxed vs. the f32/HIGHEST reference: the kernel uses default MXU precision
    # (bf16 operand rounding, f32 accumulation) and an approximate EUP reciprocal in SiLU.
    np.testing.assert_allclose(np.asarray(out), np.asarray(ref), rtol=5e-2, atol=5e-2)
    print("KERNEL_OK")
</pallas_src>

<mosaic_0001>
module attributes {stable_mosaic.version = 11 : i64} {
  func.func @dblock_kernel(%arg0: i32, %arg1: memref<1x6x512xf32, #tpu.memory_space<vmem>>, %arg2: memref<9x1x512xf32, #tpu.memory_space<vmem>>, %arg3: memref<512x128xbf16, #tpu.memory_space<vmem>>, %arg4: memref<16x6xf32, #tpu.memory_space<vmem>>, %arg5: memref<16x1xf32, #tpu.memory_space<vmem>>, %arg6: memref<12x144xf32, #tpu.memory_space<vmem>>, %arg7: memref<12x1xf32, #tpu.memory_space<vmem>>, %arg8: memref<6x12xf32, #tpu.memory_space<vmem>>, %arg9: memref<16x6xf32, #tpu.memory_space<vmem>>, %arg10: memref<16x1xf32, #tpu.memory_space<vmem>>, %arg11: memref<12x144xf32, #tpu.memory_space<vmem>>, %arg12: memref<12x1xf32, #tpu.memory_space<vmem>>, %arg13: memref<6x12xf32, #tpu.memory_space<vmem>>, %arg14: memref<6x6xf32, #tpu.memory_space<vmem>>, %arg15: memref<6x1xf32, #tpu.memory_space<vmem>>, %arg16: memref<1x6x128xf32, #tpu.memory_space<vmem>>) attributes {dimension_semantics = [#tpu.dimension_semantics<parallel>], iteration_bounds = array<i64: 1>, scalar_prefetch = 0 : i64, scratch_operands = 0 : i64, tpu.core_type = #tpu.core_type<tc>, window_params = [{transform_indices = @transform_0, window_bounds = array<i64: 1, 6, 512>}, {pipeline_mode = #tpu.pipeline_mode<synchronous>, transform_indices = @transform_1, window_bounds = array<i64: 9, 1, 512>}, {pipeline_mode = #tpu.pipeline_mode<synchronous>, transform_indices = @transform_2, window_bounds = array<i64: 512, 128>}, {pipeline_mode = #tpu.pipeline_mode<synchronous>, transform_indices = @transform_3, window_bounds = array<i64: 16, 6>}, {pipeline_mode = #tpu.pipeline_mode<synchronous>, transform_indices = @transform_4, window_bounds = array<i64: 16, 1>}, {pipeline_mode = #tpu.pipeline_mode<synchronous>, transform_indices = @transform_5, window_bounds = array<i64: 12, 144>}, {pipeline_mode = #tpu.pipeline_mode<synchronous>, transform_indices = @transform_6, window_bounds = array<i64: 12, 1>}, {pipeline_mode = #tpu.pipeline_mode<synchronous>, transform_indices = @transform_7, window_bounds = array<i64: 6, 12>}, {pipeline_mode = #tpu.pipeline_mode<synchronous>, transform_indices = @transform_8, window_bounds = array<i64: 16, 6>}, {pipeline_mode = #tpu.pipeline_mode<synchronous>, transform_indices = @transform_9, window_bounds = array<i64: 16, 1>}, {pipeline_mode = #tpu.pipeline_mode<synchronous>, transform_indices = @transform_10, window_bounds = array<i64: 12, 144>}, {pipeline_mode = #tpu.pipeline_mode<synchronous>, transform_indices = @transform_11, window_bounds = array<i64: 12, 1>}, {pipeline_mode = #tpu.pipeline_mode<synchronous>, transform_indices = @transform_12, window_bounds = array<i64: 6, 12>}, {pipeline_mode = #tpu.pipeline_mode<synchronous>, transform_indices = @transform_13, window_bounds = array<i64: 6, 6>}, {pipeline_mode = #tpu.pipeline_mode<synchronous>, transform_indices = @transform_14, window_bounds = array<i64: 6, 1>}, {transform_indices = @transform_15, window_bounds = array<i64: 1, 6, 128>}]} {
    %c0 = arith.constant 0 : index
    %c0_0 = arith.constant 0 : index
    %c0_1 = arith.constant 0 : index
    %0 = vector.load %arg1[%c0, %c0_0, %c0_1] : memref<1x6x512xf32, #tpu.memory_space<vmem>>, vector<1x6x512xf32>
    %1 = vector.shape_cast %0 : vector<1x6x512xf32> to vector<6x512xf32>
    %c0_2 = arith.constant 0 : index
    %c0_3 = arith.constant 0 : index
    %2 = vector.load %arg4[%c0_2, %c0_3] : memref<16x6xf32, #tpu.memory_space<vmem>>, vector<16x6xf32>
    %c0_4 = arith.constant 0 : index
    %c0_5 = arith.constant 0 : index
    %3 = vector.load %arg5[%c0_4, %c0_5] : memref<16x1xf32, #tpu.memory_space<vmem>>, vector<16x1xf32>
    %c0_6 = arith.constant 0 : index
    %c0_7 = arith.constant 0 : index
    %4 = vector.load %arg6[%c0_6, %c0_7] : memref<12x144xf32, #tpu.memory_space<vmem>>, vector<12x144xf32>
    %c0_8 = arith.constant 0 : index
    %c0_9 = arith.constant 0 : index
    %5 = vector.load %arg7[%c0_8, %c0_9] : memref<12x1xf32, #tpu.memory_space<vmem>>, vector<12x1xf32>
    %c0_10 = arith.constant 0 : index
    %c0_11 = arith.constant 0 : index
    %6 = vector.load %arg8[%c0_10, %c0_11] : memref<6x12xf32, #tpu.memory_space<vmem>>, vector<6x12xf32>
    %cst = arith.constant dense<0.000000e+00> : vector<16x512xf32>
    %7 = tpu.matmul %2, %1, %cst {dimension_numbers = #tpu.dot_dimension_numbers<[1], [0], [0], [1], [0, 0, 1, 1], [], []>} : vector<16x6xf32>, vector<6x512xf32>, vector<16x512xf32> -> vector<16x512xf32>
    %8 = vector.broadcast %3 : vector<16x1xf32> to vector<16x512xf32>
    %9 = arith.addf %7, %8 : vector<16x512xf32>
    %cst_12 = arith.constant 0.000000e+00 : f32
    %10 = vector.broadcast %cst_12 : f32 to vector<16x512xf32>
    %11 = arith.subf %10, %9 : vector<16x512xf32>
    %cst_13 = arith.constant 3.000000e+01 : f32
    %12 = vector.broadcast %cst_13 : f32 to vector<16x512xf32>
    %13 = arith.minimumf %11, %12 : vector<16x512xf32>
    %14 = math.exp %13 : vector<16x512xf32>
    %cst_14 = arith.constant 1.000000e+00 : f32
    %15 = vector.broadcast %cst_14 : f32 to vector<16x512xf32>
    %16 = arith.addf %15, %14 : vector<16x512xf32>
    %17 = tpu.reciprocal %16 {approx = true} : vector<16x512xf32> -> vector<16x512xf32>
    %18 = arith.mulf %9, %17 : vector<16x512xf32>
    %c17_i32 = arith.constant 17 : i32
    %19 = tpu.dynamic_rotate %18 by %c17_i32 dim 1 : vector<16x512xf32>, i32 -> vector<16x512xf32>
    %c0_15 = arith.constant 0 : index
    %c0_16 = arith.constant 0 : index
    %c0_17 = arith.constant 0 : index
    %20 = vector.load %arg2[%c0_15, %c0_16, %c0_17] : memref<9x1x512xf32, #tpu.memory_space<vmem>>, vector<1x1x512xf32>
    %21 = vector.shape_cast %20 : vector<1x1x512xf32> to vector<1x512xf32>
    %22 = vector.broadcast %21 : vector<1x512xf32> to vector<16x512xf32>
    %23 = arith.mulf %19, %22 : vector<16x512xf32>
    %c16_i32 = arith.constant 16 : i32
    %24 = tpu.dynamic_rotate %18 by %c16_i32 dim 1 : vector<16x512xf32>, i32 -> vector<16x512xf32>
    %c1 = arith.constant 1 : index
    %c0_18 = arith.constant 0 : index
    %c0_19 = arith.constant 0 : index
    %25 = vector.load %arg2[%c1, %c0_18, %c0_19] : memref<9x1x512xf32, #tpu.memory_space<vmem>>, vector<1x1x512xf32>
    %26 = vector.shape_cast %25 : vector<1x1x512xf32> to vector<1x512xf32>
    %27 = vector.broadcast %26 : vector<1x512xf32> to vector<16x512xf32>
    %28 = arith.mulf %24, %27 : vector<16x512xf32>
    %c15_i32 = arith.constant 15 : i32
    %29 = tpu.dynamic_rotate %18 by %c15_i32 dim 1 : vector<16x512xf32>, i32 -> vector<16x512xf32>
    %c2 = arith.constant 2 : index
    %c0_20 = arith.constant 0 : index
    %c0_21 = arith.constant 0 : index
    %30 = vector.load %arg2[%c2, %c0_20, %c0_21] : memref<9x1x512xf32, #tpu.memory_space<vmem>>, vector<1x1x512xf32>
    %31 = vector.shape_cast %30 : vector<1x1x512xf32> to vector<1x512xf32>
    %32 = vector.broadcast %31 : vector<1x512xf32> to vector<16x512xf32>
    %33 = arith.mulf %29, %32 : vector<16x512xf32>
    %c1_i32 = arith.constant 1 : i32
    %34 = tpu.dynamic_rotate %18 by %c1_i32 dim 1 : vector<16x512xf32>, i32 -> vector<16x512xf32>
    %c3 = arith.constant 3 : index
    %c0_22 = arith.constant 0 : index
    %c0_23 = arith.constant 0 : index
    %35 = vector.load %arg2[%c3, %c0_22, %c0_23] : memref<9x1x512xf32, #tpu.memory_space<vmem>>, vector<1x1x512xf32>
    %36 = vector.shape_cast %35 : vector<1x1x512xf32> to vector<1x512xf32>
    %37 = vector.broadcast %36 : vector<1x512xf32> to vector<16x512xf32>
    %38 = arith.mulf %34, %37 : vector<16x512xf32>
    %c511_i32 = arith.constant 511 : i32
    %39 = tpu.dynamic_rotate %18 by %c511_i32 dim 1 : vector<16x512xf32>, i32 -> vector<16x512xf32>
    %c5 = arith.constant 5 : index
    %c0_24 = arith.constant 0 : index
    %c0_25 = arith.constant 0 : index
    %40 = vector.load %arg2[%c5, %c0_24, %c0_25] : memref<9x1x512xf32, #tpu.memory_space<vmem>>, vector<1x1x512xf32>
    %41 = vector.shape_cast %40 : vector<1x1x512xf32> to vector<1x512xf32>
    %42 = vector.broadcast %41 : vector<1x512xf32> to vector<16x512xf32>
    %43 = arith.mulf %39, %42 : vector<16x512xf32>
    %c497_i32 = arith.constant 497 : i32
    %44 = tpu.dynamic_rotate %18 by %c497_i32 dim 1 : vector<16x512xf32>, i32 -> vector<16x512xf32>
    %c6 = arith.constant 6 : index
    %c0_26 = arith.constant 0 : index
    %c0_27 = arith.constant 0 : index
    %45 = vector.load %arg2[%c6, %c0_26, %c0_27] : memref<9x1x512xf32, #tpu.memory_space<vmem>>, vector<1x1x512xf32>
    %46 = vector.shape_cast %45 : vector<1x1x512xf32> to vector<1x512xf32>
    %47 = vector.broadcast %46 : vector<1x512xf32> to vector<16x512xf32>
    %48 = arith.mulf %44, %47 : vector<16x512xf32>
    %c496_i32 = arith.constant 496 : i32
    %49 = tpu.dynamic_rotate %18 by %c496_i32 dim 1 : vector<16x512xf32>, i32 -> vector<16x512xf32>
    %c7 = arith.constant 7 : index
    %c0_28 = arith.constant 0 : index
    %c0_29 = arith.constant 0 : index
    %50 = vector.load %arg2[%c7, %c0_28, %c0_29] : memref<9x1x512xf32, #tpu.memory_space<vmem>>, vector<1x1x512xf32>
    %51 = vector.shape_cast %50 : vector<1x1x512xf32> to vector<1x512xf32>
    %52 = vector.broadcast %51 : vector<1x512xf32> to vector<16x512xf32>
    %53 = arith.mulf %49, %52 : vector<16x512xf32>
    %c495_i32 = arith.constant 495 : i32
    %54 = tpu.dynamic_rotate %18 by %c495_i32 dim 1 : vector<16x512xf32>, i32 -> vector<16x512xf32>
    %c8 = arith.constant 8 : index
    %c0_30 = arith.constant 0 : index
    %c0_31 = arith.constant 0 : index
    %55 = vector.load %arg2[%c8, %c0_30, %c0_31] : memref<9x1x512xf32, #tpu.memory_space<vmem>>, vector<1x1x512xf32>
    %56 = vector.shape_cast %55 : vector<1x1x512xf32> to vector<1x512xf32>
    %57 = vector.broadcast %56 : vector<1x512xf32> to vector<16x512xf32>
    %58 = arith.mulf %54, %57 : vector<16x512xf32>
    %59 = tpu.concatenate %23, %28, %33, %38, %18, %43, %48, %53, %58 in 0 : vector<16x512xf32>, vector<16x512xf32>, vector<16x512xf32>, vector<16x512xf32>, vector<16x512xf32>, vector<16x512xf32>, vector<16x512xf32>, vector<16x512xf32>, vector<16x512xf32> -> vector<144x512xf32>
    %cst_32 = arith.constant dense<0.000000e+00> : vector<12x512xf32>
    %60 = tpu.matmul %4, %59, %cst_32 {dimension_numbers = #tpu.dot_dimension_numbers<[1], [0], [0], [1], [0, 0, 1, 1], [], []>} : vector<12x144xf32>, vector<144x512xf32>, vector<12x512xf32> -> vector<12x512xf32>
    %61 = vector.broadcast %5 : vector<12x1xf32> to vector<12x512xf32>
    %62 = arith.addf %60, %61 : vector<12x512xf32>
    %cst_33 = arith.constant 0.000000e+00 : f32
    %63 = vector.broadcast %cst_33 : f32 to vector<12x512xf32>
    %64 = arith.subf %63, %62 : vector<12x512xf32>
    %cst_34 = arith.constant 3.000000e+01 : f32
    %65 = vector.broadcast %cst_34 : f32 to vector<12x512xf32>
    %66 = arith.minimumf %64, %65 : vector<12x512xf32>
    %67 = math.exp %66 : vector<12x512xf32>
    %cst_35 = arith.constant 1.000000e+00 : f32
    %68 = vector.broadcast %cst_35 : f32 to vector<12x512xf32>
    %69 = arith.addf %68, %67 : vector<12x512xf32>
    %70 = tpu.reciprocal %69 {approx = true} : vector<12x512xf32> -> vector<12x512xf32>
    %71 = arith.mulf %62, %70 : vector<12x512xf32>
    %cst_36 = arith.constant dense<0.000000e+00> : vector<6x512xf32>
    %72 = tpu.matmul %6, %71, %cst_36 {dimension_numbers = #tpu.dot_dimension_numbers<[1], [0], [0], [1], [0, 0, 1, 1], [], []>} : vector<6x12xf32>, vector<12x512xf32>, vector<6x512xf32> -> vector<6x512xf32>
    %73 = arith.addf %1, %72 : vector<6x512xf32>
    %c0_37 = arith.constant 0 : index
    %c0_38 = arith.constant 0 : index
    %74 = vector.load %arg9[%c0_37, %c0_38] : memref<16x6xf32, #tpu.memory_space<vmem>>, vector<16x6xf32>
    %c0_39 = arith.constant 0 : index
    %c0_40 = arith.constant 0 : index
    %75 = vector.load %arg10[%c0_39, %c0_40] : memref<16x1xf32, #tpu.memory_space<vmem>>, vector<16x1xf32>
    %c0_41 = arith.constant 0 : index
    %c0_42 = arith.constant 0 : index
    %76 = vector.load %arg11[%c0_41, %c0_42] : memref<12x144xf32, #tpu.memory_space<vmem>>, vector<12x144xf32>
    %c0_43 = arith.constant 0 : index
    %c0_44 = arith.constant 0 : index
    %77 = vector.load %arg12[%c0_43, %c0_44] : memref<12x1xf32, #tpu.memory_space<vmem>>, vector<12x1xf32>
    %c0_45 = arith.constant 0 : index
    %c0_46 = arith.constant 0 : index
    %78 = vector.load %arg13[%c0_45, %c0_46] : memref<6x12xf32, #tpu.memory_space<vmem>>, vector<6x12xf32>
    %cst_47 = arith.constant dense<0.000000e+00> : vector<16x512xf32>
    %79 = tpu.matmul %74, %73, %cst_47 {dimension_numbers = #tpu.dot_dimension_numbers<[1], [0], [0], [1], [0, 0, 1, 1], [], []>} : vector<16x6xf32>, vector<6x512xf32>, vector<16x512xf32> -> vector<16x512xf32>
    %80 = vector.broadcast %75 : vector<16x1xf32> to vector<16x512xf32>
    %81 = arith.addf %79, %80 : vector<16x512xf32>
    %cst_48 = arith.constant 0.000000e+00 : f32
    %82 = vector.broadcast %cst_48 : f32 to vector<16x512xf32>
    %83 = arith.subf %82, %81 : vector<16x512xf32>
    %cst_49 = arith.constant 3.000000e+01 : f32
    %84 = vector.broadcast %cst_49 : f32 to vector<16x512xf32>
    %85 = arith.minimumf %83, %84 : vector<16x512xf32>
    %86 = math.exp %85 : vector<16x512xf32>
    %cst_50 = arith.constant 1.000000e+00 : f32
    %87 = vector.broadcast %cst_50 : f32 to vector<16x512xf32>
    %88 = arith.addf %87, %86 : vector<16x512xf32>
    %89 = tpu.reciprocal %88 {approx = true} : vector<16x512xf32> -> vector<16x512xf32>
    %90 = arith.mulf %81, %89 : vector<16x512xf32>
    %c17_i32_51 = arith.constant 17 : i32
    %91 = tpu.dynamic_rotate %90 by %c17_i32_51 dim 1 : vector<16x512xf32>, i32 -> vector<16x512xf32>
    %c0_52 = arith.constant 0 : index
    %c0_53 = arith.constant 0 : index
    %c0_54 = arith.constant 0 : index
    %92 = vector.load %arg2[%c0_52, %c0_53, %c0_54] : memref<9x1x512xf32, #tpu.memory_space<vmem>>, vector<1x1x512xf32>
    %93 = vector.shape_cast %92 : vector<1x1x512xf32> to vector<1x512xf32>
    %94 = vector.broadcast %93 : vector<1x512xf32> to vector<16x512xf32>
    %95 = arith.mulf %91, %94 : vector<16x512xf32>
    %c16_i32_55 = arith.constant 16 : i32
    %96 = tpu.dynamic_rotate %90 by %c16_i32_55 dim 1 : vector<16x512xf32>, i32 -> vector<16x512xf32>
    %c1_56 = arith.constant 1 : index
    %c0_57 = arith.constant 0 : index
    %c0_58 = arith.constant 0 : index
    %97 = vector.load %arg2[%c1_56, %c0_57, %c0_58] : memref<9x1x512xf32, #tpu.memory_space<vmem>>, vector<1x1x512xf32>
    %98 = vector.shape_cast %97 : vector<1x1x512xf32> to vector<1x512xf32>
    %99 = vector.broadcast %98 : vector<1x512xf32> to vector<16x512xf32>
    %100 = arith.mulf %96, %99 : vector<16x512xf32>
    %c15_i32_59 = arith.constant 15 : i32
    %101 = tpu.dynamic_rotate %90 by %c15_i32_59 dim 1 : vector<16x512xf32>, i32 -> vector<16x512xf32>
    %c2_60 = arith.constant 2 : index
    %c0_61 = arith.constant 0 : index
    %c0_62 = arith.constant 0 : index
    %102 = vector.load %arg2[%c2_60, %c0_61, %c0_62] : memref<9x1x512xf32, #tpu.memory_space<vmem>>, vector<1x1x512xf32>
    %103 = vector.shape_cast %102 : vector<1x1x512xf32> to vector<1x512xf32>
    %104 = vector.broadcast %103 : vector<1x512xf32> to vector<16x512xf32>
    %105 = arith.mulf %101, %104 : vector<16x512xf32>
    %c1_i32_63 = arith.constant 1 : i32
    %106 = tpu.dynamic_rotate %90 by %c1_i32_63 dim 1 : vector<16x512xf32>, i32 -> vector<16x512xf32>
    %c3_64 = arith.constant 3 : index
    %c0_65 = arith.constant 0 : index
    %c0_66 = arith.constant 0 : index
    %107 = vector.load %arg2[%c3_64, %c0_65, %c0_66] : memref<9x1x512xf32, #tpu.memory_space<vmem>>, vector<1x1x512xf32>
    %108 = vector.shape_cast %107 : vector<1x1x512xf32> to vector<1x512xf32>
    %109 = vector.broadcast %108 : vector<1x512xf32> to vector<16x512xf32>
    %110 = arith.mulf %106, %109 : vector<16x512xf32>
    %c511_i32_67 = arith.constant 511 : i32
    %111 = tpu.dynamic_rotate %90 by %c511_i32_67 dim 1 : vector<16x512xf32>, i32 -> vector<16x512xf32>
    %c5_68 = arith.constant 5 : index
    %c0_69 = arith.constant 0 : index
    %c0_70 = arith.constant 0 : index
    %112 = vector.load %arg2[%c5_68, %c0_69, %c0_70] : memref<9x1x512xf32, #tpu.memory_space<vmem>>, vector<1x1x512xf32>
    %113 = vector.shape_cast %112 : vector<1x1x512xf32> to vector<1x512xf32>
    %114 = vector.broadcast %113 : vector<1x512xf32> to vector<16x512xf32>
    %115 = arith.mulf %111, %114 : vector<16x512xf32>
    %c497_i32_71 = arith.constant 497 : i32
    %116 = tpu.dynamic_rotate %90 by %c497_i32_71 dim 1 : vector<16x512xf32>, i32 -> vector<16x512xf32>
    %c6_72 = arith.constant 6 : index
    %c0_73 = arith.constant 0 : index
    %c0_74 = arith.constant 0 : index
    %117 = vector.load %arg2[%c6_72, %c0_73, %c0_74] : memref<9x1x512xf32, #tpu.memory_space<vmem>>, vector<1x1x512xf32>
    %118 = vector.shape_cast %117 : vector<1x1x512xf32> to vector<1x512xf32>
    %119 = vector.broadcast %118 : vector<1x512xf32> to vector<16x512xf32>
    %120 = arith.mulf %116, %119 : vector<16x512xf32>
    %c496_i32_75 = arith.constant 496 : i32
    %121 = tpu.dynamic_rotate %90 by %c496_i32_75 dim 1 : vector<16x512xf32>, i32 -> vector<16x512xf32>
    %c7_76 = arith.constant 7 : index
    %c0_77 = arith.constant 0 : index
    %c0_78 = arith.constant 0 : index
    %122 = vector.load %arg2[%c7_76, %c0_77, %c0_78] : memref<9x1x512xf32, #tpu.memory_space<vmem>>, vector<1x1x512xf32>
    %123 = vector.shape_cast %122 : vector<1x1x512xf32> to vector<1x512xf32>
    %124 = vector.broadcast %123 : vector<1x512xf32> to vector<16x512xf32>
    %125 = arith.mulf %121, %124 : vector<16x512xf32>
    %c495_i32_79 = arith.constant 495 : i32
    %126 = tpu.dynamic_rotate %90 by %c495_i32_79 dim 1 : vector<16x512xf32>, i32 -> vector<16x512xf32>
    %c8_80 = arith.constant 8 : index
    %c0_81 = arith.constant 0 : index
    %c0_82 = arith.constant 0 : index
    %127 = vector.load %arg2[%c8_80, %c0_81, %c0_82] : memref<9x1x512xf32, #tpu.memory_space<vmem>>, vector<1x1x512xf32>
    %128 = vector.shape_cast %127 : vector<1x1x512xf32> to vector<1x512xf32>
    %129 = vector.broadcast %128 : vector<1x512xf32> to vector<16x512xf32>
    %130 = arith.mulf %126, %129 : vector<16x512xf32>
    %131 = tpu.concatenate %95, %100, %105, %110, %90, %115, %120, %125, %130 in 0 : vector<16x512xf32>, vector<16x512xf32>, vector<16x512xf32>, vector<16x512xf32>, vector<16x512xf32>, vector<16x512xf32>, vector<16x512xf32>, vector<16x512xf32>, vector<16x512xf32> -> vector<144x512xf32>
    %cst_83 = arith.constant dense<0.000000e+00> : vector<12x512xf32>
    %132 = tpu.matmul %76, %131, %cst_83 {dimension_numbers = #tpu.dot_dimension_numbers<[1], [0], [0], [1], [0, 0, 1, 1], [], []>} : vector<12x144xf32>, vector<144x512xf32>, vector<12x512xf32> -> vector<12x512xf32>
    %133 = vector.broadcast %77 : vector<12x1xf32> to vector<12x512xf32>
    %134 = arith.addf %132, %133 : vector<12x512xf32>
    %cst_84 = arith.constant 0.000000e+00 : f32
    %135 = vector.broadcast %cst_84 : f32 to vector<12x512xf32>
    %136 = arith.subf %135, %134 : vector<12x512xf32>
    %cst_85 = arith.constant 3.000000e+01 : f32
    %137 = vector.broadcast %cst_85 : f32 to vector<12x512xf32>
    %138 = arith.minimumf %136, %137 : vector<12x512xf32>
    %139 = math.exp %138 : vector<12x512xf32>
    %cst_86 = arith.constant 1.000000e+00 : f32
    %140 = vector.broadcast %cst_86 : f32 to vector<12x512xf32>
    %141 = arith.addf %140, %139 : vector<12x512xf32>
    %142 = tpu.reciprocal %141 {approx = true} : vector<12x512xf32> -> vector<12x512xf32>
    %143 = arith.mulf %134, %142 : vector<12x512xf32>
    %cst_87 = arith.constant dense<0.000000e+00> : vector<6x512xf32>
    %144 = tpu.matmul %78, %143, %cst_87 {dimension_numbers = #tpu.dot_dimension_numbers<[1], [0], [0], [1], [0, 0, 1, 1], [], []>} : vector<6x12xf32>, vector<12x512xf32>, vector<6x512xf32> -> vector<6x512xf32>
    %145 = arith.addf %73, %144 : vector<6x512xf32>
    %146 = arith.truncf %145 : vector<6x512xf32> to vector<6x512xbf16>
    %c0_88 = arith.constant 0 : index
    %c0_89 = arith.constant 0 : index
    %147 = vector.load %arg3[%c0_88, %c0_89] : memref<512x128xbf16, #tpu.memory_space<vmem>>, vector<512x128xbf16>
    %cst_90 = arith.constant dense<0.000000e+00> : vector<6x128xf32>
    %148 = tpu.matmul %146, %147, %cst_90 {dimension_numbers = #tpu.dot_dimension_numbers<[1], [0], [0], [1], [0, 0, 1, 1], [], []>} : vector<6x512xbf16>, vector<512x128xbf16>, vector<6x128xf32> -> vector<6x128xf32>
    %c0_91 = arith.constant 0 : index
    %c0_92 = arith.constant 0 : index
    %149 = vector.load %arg14[%c0_91, %c0_92] : memref<6x6xf32, #tpu.memory_space<vmem>>, vector<6x6xf32>
    %cst_93 = arith.constant dense<0.000000e+00> : vector<6x128xf32>
    %150 = tpu.matmul %149, %148, %cst_93 {dimension_numbers = #tpu.dot_dimension_numbers<[1], [0], [0], [1], [0, 0, 1, 1], [], []>} : vector<6x6xf32>, vector<6x128xf32>, vector<6x128xf32> -> vector<6x128xf32>
    %c0_94 = arith.constant 0 : index
    %c0_95 = arith.constant 0 : index
    %151 = vector.load %arg15[%c0_94, %c0_95] : memref<6x1xf32, #tpu.memory_space<vmem>>, vector<6x1xf32>
    %152 = vector.broadcast %151 : vector<6x1xf32> to vector<6x128xf32>
    %153 = arith.addf %150, %152 : vector<6x128xf32>
    %c0_96 = arith.constant 0 : index
    %c0_97 = arith.constant 0 : index
    %c0_98 = arith.constant 0 : index
    %154 = vector.load %arg16[%c0_96, %c0_97, %c0_98] : memref<1x6x128xf32, #tpu.memory_space<vmem>>, vector<1x6x128xf32>
    %155 = vector.shape_cast %154 : vector<1x6x128xf32> to vector<6x128xf32>
    %156 = vector.shape_cast %153 : vector<6x128xf32> to vector<1x6x128xf32>
    tpu.vector_store %arg16[%c0_96, %c0_97, %c0_98], %156 {strides = array<i32>} : memref<1x6x128xf32, #tpu.memory_space<vmem>>, vector<1x6x128xf32>,
    return
  }
  func.func @transform_0(%arg0: i32) -> (i32, i32, i32) {
    %c0_i32 = arith.constant 0 : i32
    %c0_i32_0 = arith.constant 0 : i32
    %c0_i32_1 = arith.constant 0 : i32
    return %arg0, %c0_i32, %c0_i32_0 : i32, i32, i32
  }
  func.func @transform_1(%arg0: i32) -> (i32, i32, i32) {
    %c0_i32 = arith.constant 0 : i32
    %c0_i32_0 = arith.constant 0 : i32
    %c0_i32_1 = arith.constant 0 : i32
    %c0_i32_2 = arith.constant 0 : i32
    return %c0_i32, %c0_i32_0, %c0_i32_1 : i32, i32, i32
  }
  func.func @transform_2(%arg0: i32) -> (i32, i32) {
    %c0_i32 = arith.constant 0 : i32
    %c0_i32_0 = arith.constant 0 : i32
    %c0_i32_1 = arith.constant 0 : i32
    return %c0_i32, %c0_i32_0 : i32, i32
  }
  func.func @transform_3(%arg0: i32) -> (i32, i32) {
    %c0_i32 = arith.constant 0 : i32
    %c0_i32_0 = arith.constant 0 : i32
    %c0_i32_1 = arith.constant 0 : i32
    return %c0_i32, %c0_i32_0 : i32, i32
  }
  func.func @transform_4(%arg0: i32) -> (i32, i32) {
    %c0_i32 = arith.constant 0 : i32
    %c0_i32_0 = arith.constant 0 : i32
    %c0_i32_1 = arith.constant 0 : i32
    return %c0_i32, %c0_i32_0 : i32, i32
  }
  func.func @transform_5(%arg0: i32) -> (i32, i32) {
    %c0_i32 = arith.constant 0 : i32
    %c0_i32_0 = arith.constant 0 : i32
    %c0_i32_1 = arith.constant 0 : i32
    return %c0_i32, %c0_i32_0 : i32, i32
  }
  func.func @transform_6(%arg0: i32) -> (i32, i32) {
    %c0_i32 = arith.constant 0 : i32
    %c0_i32_0 = arith.constant 0 : i32
    %c0_i32_1 = arith.constant 0 : i32
    return %c0_i32, %c0_i32_0 : i32, i32
  }
  func.func @transform_7(%arg0: i32) -> (i32, i32) {
    %c0_i32 = arith.constant 0 : i32
    %c0_i32_0 = arith.constant 0 : i32
    %c0_i32_1 = arith.constant 0 : i32
    return %c0_i32, %c0_i32_0 : i32, i32
  }
  func.func @transform_8(%arg0: i32) -> (i32, i32) {
    %c0_i32 = arith.constant 0 : i32
    %c0_i32_0 = arith.constant 0 : i32
    %c0_i32_1 = arith.constant 0 : i32
    return %c0_i32, %c0_i32_0 : i32, i32
  }
  func.func @transform_9(%arg0: i32) -> (i32, i32) {
    %c0_i32 = arith.constant 0 : i32
    %c0_i32_0 = arith.constant 0 : i32
    %c0_i32_1 = arith.constant 0 : i32
    return %c0_i32, %c0_i32_0 : i32, i32
  }
  func.func @transform_10(%arg0: i32) -> (i32, i32) {
    %c0_i32 = arith.constant 0 : i32
    %c0_i32_0 = arith.constant 0 : i32
    %c0_i32_1 = arith.constant 0 : i32
    return %c0_i32, %c0_i32_0 : i32, i32
  }
  func.func @transform_11(%arg0: i32) -> (i32, i32) {
    %c0_i32 = arith.constant 0 : i32
    %c0_i32_0 = arith.constant 0 : i32
    %c0_i32_1 = arith.constant 0 : i32
    return %c0_i32, %c0_i32_0 : i32, i32
  }
  func.func @transform_12(%arg0: i32) -> (i32, i32) {
    %c0_i32 = arith.constant 0 : i32
    %c0_i32_0 = arith.constant 0 : i32
    %c0_i32_1 = arith.constant 0 : i32
    return %c0_i32, %c0_i32_0 : i32, i32
  }
  func.func @transform_13(%arg0: i32) -> (i32, i32) {
    %c0_i32 = arith.constant 0 : i32
    %c0_i32_0 = arith.constant 0 : i32
    %c0_i32_1 = arith.constant 0 : i32
    return %c0_i32, %c0_i32_0 : i32, i32
  }
  func.func @transform_14(%arg0: i32) -> (i32, i32) {
    %c0_i32 = arith.constant 0 : i32
    %c0_i32_0 = arith.constant 0 : i32
    %c0_i32_1 = arith.constant 0 : i32
    return %c0_i32, %c0_i32_0 : i32, i32
  }
  func.func @transform_15(%arg0: i32) -> (i32, i32, i32) {
    %c0_i32 = arith.constant 0 : i32
    %c0_i32_0 = arith.constant 0 : i32
    %c0_i32_1 = arith.constant 0 : i32
    return %arg0, %c0_i32, %c0_i32_0 : i32, i32, i32
  }
}

</mosaic_0001>

<bundles_post_ra>
// kernel: tpu_custom_call.1
= control target key start
LH: loop header
LB: loop body
LE: loop exit
PB: predicated region body
PF: predicated region fallthrough
CT: control target
= control target key end

     0   :  { %20 = vsyncpa [#allocation3], 0  ;;  %s2810_s18 = smov [#allocation2]   ;;  %s4243_s0 = inlined_call_operand.vmem [shape: f32[1,6,512], index: 0, kind: input, shape index: {}]   ;;  %s4244_s1 = inlined_call_operand.vmem [shape: f32[9,1,512], index: 1, kind: input, shape index: {}]   ;;  %s4245_s2 = inlined_call_operand.hbm [shape: bf16[512,128], index: 2, kind: input, shape index: {}]   ;;  %s4246_s3 = inlined_call_operand.vmem [shape: f32[16,6], index: 3, kind: input, shape index: {}]   ;;  %s4247_s4 = inlined_call_operand.vmem [shape: f32[16,1], index: 4, kind: input, shape index: {}]   ;;  %s4248_s5 = inlined_call_operand.vmem [shape: f32[12,144], index: 5, kind: input, shape index: {}]   ;;  %s4249_s6 = inlined_call_operand.vmem [shape: f32[12,1], index: 6, kind: input, shape index: {}]   ;;  %s4250_s7 = inlined_call_operand.vmem [shape: f32[6,12], index: 7, kind: input, shape index: {}]   ;;  %s4251_s8 = inlined_call_operand.vmem [shape: f32[16,6], index: 8, kind: input, shape index: {}]   ;;  %s4252_s9 = inlined_call_operand.vmem [shape: f32[16,1], index: 9, kind: input, shape index: {}]   ;;  %s4253_s10 = inlined_call_operand.vmem [shape: f32[12,144], index: 10, kind: input, shape index: {}]   ;;  %s4254_s11 = inlined_call_operand.vmem [shape: f32[12,1], index: 11, kind: input, shape index: {}]   ;;  %s4255_s12 = inlined_call_operand.vmem [shape: f32[6,12], index: 12, kind: input, shape index: {}]   ;;  %s4256_s13 = inlined_call_operand.vmem [shape: f32[6,6], index: 13, kind: input, shape index: {}]   ;;  %s4257_s14 = inlined_call_operand.vmem [shape: f32[6,1], index: 14, kind: input, shape index: {}]   ;;  %s4258_s15 = inlined_call_operand.vmem [shape: f32[1,6,128], index: 15, kind: output, shape index: {}]  }
   0x1   :  { %s30_s19 = sshll.u32 %s2810_s18, 4  ;;  %s31_s19 = int_to_ptr.vmem [resolvable:$true] %s30_s19 }
   0x2   :  { %s2796_s20 = scalar_lea.vmem %s31_s19, 4096  ;;  %p2801_p1 = scmp.lt.s32.totalorder %s31_s19, %s31_s19 }
   0x3   :  { %p2797_p0 = scmp.ne.s32.totalorder %s31_s19, %s2796_s20  ;;  %p2802_p2 = scmp.lt.s32.totalorder %s2796_s20, %s2796_s20 }
   0x5   :  { %p2803_p3 = por %p2802_p2, %p2801_p1 }
   0x7   :  { %p2804_p4 = pnand %p2803_p3, %p2797_p0 }
   0x9   :  { %2807 = shalt.err (!%p2804_p4)
}
   0xa   :  { %s2811_s21 = smov 64   ;;  %s2812_s22 = smov 4  }
   0xb   :  { %36 = dma.hbm_to_vmem [thread:$0]  %s4245_s2, 4096, %s31_s19, [#allocation3], %s2811_s21, %s2811_s21, %s2812_s22  }
   0xc   :  { %2808 = dma.done.wait [#allocation3], 4096  }
   0xd   :  { %2809 = vsyncadd [#allocation3], 4294963200  ;;  %v4259_v0 = vmov 0.0   ;;  %v2814_v1 = vmov 0   ;;  %vm97_vm0 = vcmask 1045504   ;;  %vm90_vm1 = vcmask 48128  }
   0xe   :  { %174 = vmatprep.mubr.f32.mxu0 %v4259_v0  ;;  %251 = vmatprep.mubr.f32.mxu1 %v4259_v0  ;;  %v66_v2 = vld [vmem:[%s4243_s0 + $0x8] sm:$0x3f]  ;;  %v68_v3 = vld [vmem:[%s4243_s0 + $0x18] sm:$0x3f]  ;;  %v65_v4 = vld [vmem:[%s4243_s0] sm:$0x3f] }
   0xf   :  { %2622 = vset.pattern.permute.xlu0 %v2814_v1  ;;  %2623 = vset.pattern.permute.xlu1 %v2814_v1  ;;  %v67_v5 = vld [vmem:[%s4243_s0 + $0x10] sm:$0x3f]  ;;  %v69_v6 = vld [vmem:[%s4246_s3] sm:$0xff]  ;;  %v70_v7 = vld [vmem:[%s4246_s3 + $0x8] sm:$0xff]  ;;  %s2815_s3 = smov 112   ;;  %s2817_s25 = smov 127  }
  0x10   :  { %2480 = vmatprep.subr.msk.mxu0 %vm97_vm0, %v66_v2  ;;  %2484 = vmatprep.subr.msk.mxu1 %vm97_vm0, %v68_v3  ;;  %v72_v8 = vld [vmem:[%s4247_s4 + $0x8] sm:$0xff]  ;;  %v71_v9 = vld [vmem:[%s4247_s4] sm:$0xff]  ;;  %s2816_s4 = smov 113   ;;  %s2818_s26 = smov 1   ;;  %vm779_vm2 = vcmask 130048   ;;  %vm1000_vm11 = vcmask 1043456  }
  0x11   :  { %2481 = vmatpush1.msk.msra.mxu0 %vm97_vm0, %v65_v4  ;;  %2485 = vmatpush1.msk.msra.mxu1 %vm97_vm0, %v67_v5  ;;  %s2819_s27 = smov 15   ;;  %s2820_s28 = smov 16   ;;  %vm996_vm12 = vcmask 97280   ;;  %vm2823_vm13 = vmmov 0  }
  0x12   :  { %2482 = vmatmul.mubr.msk.f32.vlgmr.msra.gmra.mxu0 %vm90_vm1, %v69_v6  ;;  %2486 = vmatmul.mubr.msk.f32.vlgmr.msra.gmra.mxu1 %vm90_vm1, %v69_v6  ;;  %s2821_s2 = smov 17   ;;  %s2822_s29 = smov 111  }
  0x13   :  { %180 = vmatprep.mubr.f32.mxu0 %v4259_v0  ;;  %257 = vmatprep.mubr.f32.mxu1 %v4259_v0 }
  0x14   :  { %87 = vperm.xlu0 %2622, %v72_v8  }
  0x16   :  { %2483 = vmatmul.mubr.msk.f32.gmra.mxu0 %vm90_vm1, %v70_v7  ;;  %2487 = vmatmul.mubr.msk.f32.gmra.mxu1 %vm90_vm1, %v70_v7 }
  0x18   :  { %82 = vperm.xlu0 %2622, %v71_v9  }
  0x8f   :  { %v2943_v10 = vpop.permute.xlu0 %87 }
  0x93   :  { %v83_v11 = vpop.permute.xlu0 %82 }
  0xd2   :  { %v176_v12 = vpop.f32.mrf.mxu0  ;;  %v253_v13 = vpop.f32.mrf.mxu1 }
  0xd3   :  { %v177_v14 = vadd.f32 %v176_v12, %v83_v11  ;;  %v254_v15 = vadd.f32 %v253_v13, %v83_v11 }
  0xd4   :  { %v178_v16 = vpop.f32.mrf.mxu0  ;;  %v255_v17 = vpop.f32.mrf.mxu1 }
  0xd5   :  { %v264_v18 = vsub.f32 0.0, %v177_v14  ;;  %v266_v19 = vsub.f32 0.0, %v254_v15  ;;  %v179_v20 = vadd.f32 %v178_v16, %v83_v11  ;;  %v256_v21 = vadd.f32 %v255_v17, %v83_v11 }
  0xd6   :  { %v259_v47 = vpop.f32.mrf.mxu1  ;;  %v182_v49 = vpop.f32.mrf.mxu0 }
  0xd7   :  { %v272_v22 = vmin.f32 %v264_v18, 30.0  ;;  %v274_v23 = vmin.f32 %v266_v19, 30.0  ;;  %v265_v24 = vsub.f32 0.0, %v179_v20  ;;  %v267_v25 = vsub.f32 0.0, %v256_v21 }
  0xd8   :  { %v2960_v50 = vadd.f32 %v259_v47, %v2943_v10  ;;  %v2965_v51 = vadd.f32 %v182_v49, %v2943_v10  ;;  %v184_v52 = vpop.f32.mrf.mxu0  ;;  %v261_v56 = vpop.f32.mrf.mxu1 }
  0xd9   :  { %v280_v26 = vmul.f32 1.442695, %v272_v22  ;;  %v284_v27 = vmul.f32 1.442695, %v274_v23  ;;  %v273_v28 = vmin.f32 %v265_v24, 30.0  ;;  %v275_v29 = vmin.f32 %v267_v25, 30.0 }
  0xda   :  { %v270_v53 = vsub.f32 0.0, %v2960_v50  ;;  %v268_v54 = vsub.f32 0.0, %v2965_v51  ;;  %v2974_v55 = vadd.f32 %v184_v52, %v2943_v10  ;;  %v2982_v60 = vadd.f32 %v261_v56, %v2943_v10  ;;  %v74_v22 = vld [vmem:[%s4248_s5 + $0x8] sm:$0xff] }
  0xdb   :  { %2656 = vpow2.f32 %v280_v26  ;;  %v282_v30 = vmul.f32 1.442695, %v273_v28  ;;  %v286_v31 = vmul.f32 1.442695, %v275_v29  ;;  %2495 = vmatprep.mubr.msk.f32.mxu0 %vm779_vm2, %v74_v22  ;;  %2497 = vmatprep.mubr.msk.f32.mxu1 %vm779_vm2, %v74_v22  ;;  %v78_v26 = vld [vmem:[%s4249_s6 + $0x8] sm:$0xf] }
  0xdc   :  { %2658 = vpow2.f32 %v284_v27  ;;  %v278_v57 = vmin.f32 %v270_v53, 30.0  ;;  %v276_v58 = vmin.f32 %v268_v54, 30.0  ;;  %v269_v59 = vsub.f32 0.0, %v2974_v55  ;;  %v1162_v29 = vld [vmem:[%s4252_s9 + $0x8] sm:$0xff] }
  0xdd   :  { %2660 = vpow2.f32 %v282_v30  ;;  %v271_v1 = vsub.f32 0.0, %v2982_v60 }
  0xde   :  { %2662 = vpow2.f32 %v286_v31  ;;  %v292_v61 = vmul.f32 1.442695, %v278_v57  ;;  %v288_v62 = vmul.f32 1.442695, %v276_v58  ;;  %v277_v63 = vmin.f32 %v269_v59, 30.0 }
  0xdf   :  { %v279_v3 = vmin.f32 %v271_v1, 30.0  ;;  %v336_v57 = vlaneseq }
  0xe0   :  { %v290_v2 = vmul.f32 1.442695, %v277_v63 }
  0xe1   :  { %v294_v4 = vmul.f32 1.442695, %v279_v3  ;;  %v3186_v63 = vand.u32 127, %v336_v57 }
  0xe3   :  { %vm673_vm3 = vcmp.lt.s32.totalorder %v3186_v63, 112  ;;  %vm617_vm4 = vcmp.lt.s32.totalorder %v3186_v63, 113  ;;  %vm561_vm5 = vcmp.lt.s32.totalorder %v3186_v63, 127  ;;  %vm505_vm6 = vcmp.lt.s32.totalorder %v3186_v63, 1 }
  0xe4   :  { %vm449_vm7 = vcmp.lt.s32.totalorder %v3186_v63, 15  ;;  %vm393_vm8 = vcmp.lt.s32.totalorder %v3186_v63, 16  ;;  %vm338_vm9 = vcmp.lt.s32.totalorder %v3186_v63, 17  ;;  %vm729_vm10 = vcmp.lt.s32.totalorder %v3186_v63, 111  ;;  %v1165_v63 = vld [vmem:[%s4253_s10 + $0x10] sm:$0xf] }
  0xe8   :  { %v2657_v32 = vpop.eup %2656 }
  0xe9   :  { %v2659_v33 = vpop.eup %2658  ;;  %v296_v34 = vadd.f32 1.0, %v2657_v32 }
  0xea   :  { %v2661_v35 = vpop.eup %2660  ;;  %v298_v36 = vadd.f32 1.0, %v2659_v33  ;;  %v77_v33 = vld [vmem:[%s4249_s6] sm:$0xff] }
  0xeb   :  { %v2663_v37 = vpop.eup %2662  ;;  %2664 = vrcp.f32 %v296_v34  ;;  %v297_v38 = vadd.f32 1.0, %v2661_v35 }
  0xec   :  { %2666 = vrcp.f32 %v298_v36  ;;  %v299_v39 = vadd.f32 1.0, %v2663_v37  ;;  %v1161_v36 = vld [vmem:[%s4252_s9] sm:$0xff] }
  0xed   :  { %2668 = vrcp.f32 %v297_v38 }
  0xee   :  { %2670 = vrcp.f32 %v299_v39 }
  0xef   :  { %2672 = vpow2.f32 %v292_v61 }
  0xf0   :  { %2674 = vpow2.f32 %v288_v62 }
  0xf1   :  { %2676 = vpow2.f32 %v290_v2 }
  0xf2   :  { %2678 = vpow2.f32 %v294_v4  ;;  %v2493_v4 = vld [vmem:[%s4244_s1 + $0x1c] sm:$0xf] }
  0xf8   :  { %v2665_v40 = vpop.eup %2664 }
  0xf9   :  { %v2667_v41 = vpop.eup %2666  ;;  %v2945_v42 = vmul.f32 %v2665_v40, %v177_v14 }
  0xfa   :  { %v2669_v43 = vpop.eup %2668  ;;  %v2951_v46 = vmul.f32 %v2667_v41, %v254_v15 }
  0xfb   :  { %v2947_v44 = vmul.f32 %v2669_v43, %v179_v20  ;;  %657 = vrot.lane.b32.xlu0 %v2945_v42, %s2815_s3  ;;  %v2671_v45 = vpop.eup %2670 }
  0xfc   :  { %v2955_v48 = vmul.f32 %v2671_v45, %v256_v21  ;;  %v2673_v5 = vpop.eup %2672 }
  0xfd   :  { %661 = vrot.lane.b32.xlu1 %v2947_v44, %s2815_s3  ;;  %v2675_v6 = vpop.eup %2674  ;;  %v302_v7 = vadd.f32 1.0, %v2673_v5 }
  0xfe   :  { %v300_v8 = vadd.f32 1.0, %v2675_v6  ;;  %v2677_v9 = vpop.eup %2676 }
  0xff   :  { %665 = vrot.lane.b32.xlu0 %v2951_v46, %s2815_s3  ;;  %2680 = vrcp.f32 %v302_v7  ;;  %v301_v10 = vadd.f32 1.0, %v2677_v9  ;;  %v2679_v11 = vpop.eup %2678 }
 0x100   :  { %2682 = vrcp.f32 %v300_v8  ;;  %v303_v12 = vadd.f32 1.0, %v2679_v11 }
 0x101   :  { %669 = vrot.lane.b32.xlu1 %v2955_v48, %s2815_s3  ;;  %2684 = vrcp.f32 %v301_v10 }
 0x102   :  { %2686 = vrcp.f32 %v303_v12 }
 0x103   :  { %601 = vrot.lane.b32.xlu0 %v2945_v42, %s2816_s4 }
 0x105   :  { %605 = vrot.lane.b32.xlu1 %v2947_v44, %s2816_s4 }
 0x107   :  { %609 = vrot.lane.b32.xlu0 %v2951_v46, %s2816_s4 }
 0x109   :  { %613 = vrot.lane.b32.xlu1 %v2955_v48, %s2816_s4 }
 0x10b   :  { %545 = vrot.lane.b32.xlu0 %v2945_v42, %s2817_s25 }
 0x10c   :  { %v2681_v13 = vpop.eup %2680 }
 0x10d   :  { %549 = vrot.lane.b32.xlu1 %v2947_v44, %s2817_s25  ;;  %v2683_v14 = vpop.eup %2682  ;;  %v3028_v15 = vmul.f32 %v2681_v13, %v2960_v50 }
 0x10e   :  { %v3033_v16 = vmul.f32 %v2683_v14, %v2965_v51  ;;  %v2685_v17 = vpop.eup %2684 }
 0x10f   :  { %553 = vrot.lane.b32.xlu0 %v2951_v46, %s2817_s25  ;;  %v3040_v18 = vmul.f32 %v2685_v17, %v2974_v55  ;;  %v2687_v19 = vpop.eup %2686 }
 0x110   :  { %v3047_v20 = vmul.f32 %v2687_v19, %v2982_v60  ;;  %v350_v60 = vshrl.u32 %v336_v57, 7 }
 0x111   :  { %557 = vrot.lane.b32.xlu1 %v2955_v48, %s2817_s25 }
 0x112   :  { %v3188_v1 = vsub.s32 0, %v350_v60  ;;  %v3190_v3 = vsub.s32 1, %v350_v60  ;;  %v3199_v7 = vsub.s32 2, %v350_v60  ;;  %v3204_v10 = vsub.s32 3, %v350_v60  ;;  %v2492_v60 = vld [vmem:[%s4244_s1 + $0x18] sm:$0xf] }
 0x113   :  { %489 = vrot.lane.b32.xlu0 %v2945_v42, %s2818_s26 }
 0x114   :  { %v3197_v6 = vrot.slane %v2493_v4, %v3188_v1  ;;  %v3202_v9 = vrot.slane %v2493_v4, %v3190_v3 }
 0x115   :  { %493 = vrot.lane.b32.xlu1 %v2947_v44, %s2818_s26 }
 0x117   :  { %497 = vrot.lane.b32.xlu0 %v2951_v46, %s2818_s26 }
 0x119   :  { %501 = vrot.lane.b32.xlu1 %v2955_v48, %s2818_s26 }
 0x11b   :  { %433 = vrot.lane.b32.xlu0 %v2945_v42, %s2819_s27 }
 0x11d   :  { %437 = vrot.lane.b32.xlu1 %v2947_v44, %s2819_s27 }
 0x11f   :  { %441 = vrot.lane.b32.xlu0 %v2951_v46, %s2819_s27 }
 0x121   :  { %445 = vrot.lane.b32.xlu1 %v2955_v48, %s2819_s27 }
 0x123   :  { %377 = vrot.lane.b32.xlu0 %v2945_v42, %s2820_s28 }
 0x125   :  { %381 = vrot.lane.b32.xlu1 %v2947_v44, %s2820_s28 }
 0x127   :  { %385 = vrot.lane.b32.xlu0 %v2951_v46, %s2820_s28 }
 0x129   :  { %389 = vrot.lane.b32.xlu1 %v2955_v48, %s2820_s28 }
 0x12b   :  { %320 = vrot.lane.b32.xlu0 %v2945_v42, %s2821_s2 }
 0x12d   :  { %324 = vrot.lane.b32.xlu1 %v2947_v44, %s2821_s2 }
 0x12f   :  { %328 = vrot.lane.b32.xlu0 %v2951_v46, %s2821_s2 }
 0x131   :  { %332 = vrot.lane.b32.xlu1 %v2955_v48, %s2821_s2 }
 0x133   :  { %713 = vrot.lane.b32.xlu0 %v2945_v42, %s2822_s29 }
 0x135   :  { %717 = vrot.lane.b32.xlu1 %v2947_v44, %s2822_s29 }
 0x137   :  { %667 = vrot.lane.b32.xlu0 %v3028_v15, %s2815_s3 }
 0x139   :  { %659 = vrot.lane.b32.xlu1 %v3033_v16, %s2815_s3 }
 0x13b   :  { %603 = vrot.lane.b32.xlu0 %v3033_v16, %s2816_s4 }
 0x13d   :  { %663 = vrot.lane.b32.xlu1 %v3040_v18, %s2815_s3 }
 0x13f   :  { %611 = vrot.lane.b32.xlu0 %v3028_v15, %s2816_s4 }
 0x141   :  { %671 = vrot.lane.b32.xlu1 %v3047_v20, %s2815_s3 }
 0x143   :  { %547 = vrot.lane.b32.xlu0 %v3033_v16, %s2817_s25 }
 0x145   :  { %607 = vrot.lane.b32.xlu1 %v3040_v18, %s2816_s4 }
 0x147   :  { %555 = vrot.lane.b32.xlu0 %v3028_v15, %s2817_s25 }
 0x149   :  { %615 = vrot.lane.b32.xlu1 %v3047_v20, %s2816_s4 }
 0x14b   :  { %491 = vrot.lane.b32.xlu0 %v3033_v16, %s2818_s26 }
 0x14d   :  { %551 = vrot.lane.b32.xlu1 %v3040_v18, %s2817_s25 }
 0x14f   :  { %499 = vrot.lane.b32.xlu0 %v3028_v15, %s2818_s26 }
 0x151   :  { %559 = vrot.lane.b32.xlu1 %v3047_v20, %s2817_s25 }
 0x153   :  { %435 = vrot.lane.b32.xlu0 %v3033_v16, %s2819_s27 }
 0x155   :  { %495 = vrot.lane.b32.xlu1 %v3040_v18, %s2818_s26 }
 0x157   :  { %443 = vrot.lane.b32.xlu0 %v3028_v15, %s2819_s27 }
 0x159   :  { %503 = vrot.lane.b32.xlu1 %v3047_v20, %s2818_s26 }
 0x15b   :  { %379 = vrot.lane.b32.xlu0 %v3033_v16, %s2820_s28 }
 0x15d   :  { %439 = vrot.lane.b32.xlu1 %v3040_v18, %s2819_s27 }
 0x15f   :  { %387 = vrot.lane.b32.xlu0 %v3028_v15, %s2820_s28 }
 0x161   :  { %447 = vrot.lane.b32.xlu1 %v3047_v20, %s2819_s27 }
 0x163   :  { %322 = vrot.lane.b32.xlu0 %v3033_v16, %s2821_s2 }
 0x165   :  { %383 = vrot.lane.b32.xlu1 %v3040_v18, %s2820_s28 }
 0x167   :  { %330 = vrot.lane.b32.xlu0 %v3028_v15, %s2821_s2 }
 0x169   :  { %391 = vrot.lane.b32.xlu1 %v3047_v20, %s2820_s28 }
 0x16b   :  { %715 = vrot.lane.b32.xlu0 %v3033_v16, %s2822_s29 }
 0x16d   :  { %326 = vrot.lane.b32.xlu1 %v3040_v18, %s2821_s2  ;;  %v3097_v21 = vpop.permute.xlu0 %657 }
 0x16f   :  { %v3102_v23 = vpop.permute.xlu1 %661  ;;  %723 = vrot.lane.b32.xlu0 %v3028_v15, %s2822_s29 }
 0x170   :  { %v678_v14 = vsel %vm673_vm3, %v3097_v21, %v3102_v23 }
 0x171   :  { %334 = vrot.lane.b32.xlu1 %v3047_v20, %s2821_s2  ;;  %v3110_v24 = vpop.permute.xlu0 %665  ;;  %v705_v57 = vmul.f32 %v3197_v6, %v678_v14 }
 0x172   :  { %v676_v11 = vsel %vm673_vm3, %v3102_v23, %v3110_v24 }
 0x173   :  { %v3112_v25 = vpop.permute.xlu1 %669  ;;  %721 = vrot.lane.b32.xlu0 %v2951_v46, %s2822_s29 }
 0x174   :  { %v680_v23 = vsel %vm673_vm3, %v3112_v25, %v3097_v21 }
 0x175   :  { %719 = vrot.lane.b32.xlu1 %v3040_v18, %s2822_s29  ;;  %v3121_v27 = vpop.permute.xlu0 %601 }
 0x177   :  { %v3123_v28 = vpop.permute.xlu1 %605  ;;  %776 = vperm.xlu0 %2622, %v78_v26   ;;  %v3221_v26 = vrot.slane %v2493_v4, %v3199_v7 }
 0x179   :  { %727 = vrot.lane.b32.xlu1 %v3047_v20, %s2822_s29  ;;  %v3130_v30 = vpop.permute.xlu0 %609 }
 0x17b   :  { %v3132_v31 = vpop.permute.xlu1 %613  ;;  %1177 = vperm.xlu0 %2622, %v1162_v29  }
 0x17d   :  { %725 = vrot.lane.b32.xlu1 %v2955_v48, %s2822_s29  ;;  %v3136_v32 = vpop.permute.xlu0 %545 }
 0x17f   :  { %v3141_v34 = vpop.permute.xlu1 %549 }
 0x181   :  { %v3143_v35 = vpop.permute.xlu0 %553  ;;  %771 = vperm.xlu1 %2623, %v77_v33   ;;  %v706_v33 = vmul.f32 %v3202_v9, %v676_v11 }
 0x183   :  { %v3148_v37 = vpop.permute.xlu1 %557 }
 0x185   :  { %v3150_v38 = vpop.permute.xlu0 %489  ;;  %1172 = vperm.xlu1 %2623, %v1161_v36   ;;  %v3225_v36 = vrot.slane %v2493_v4, %v3204_v10  ;;  %v674_v4 = vsel %vm673_vm3, %v3110_v24, %v3112_v25  ;;  %v620_v25 = vsel %vm617_vm4, %v3123_v28, %v3130_v30 }
 0x186   :  { %v707_v24 = vmul.f32 %v3221_v26, %v674_v4  ;;  %v3274_v4 = vrot.slane %v2492_v60, %v3204_v10 }
 0x187   :  { %v3152_v39 = vpop.permute.xlu1 %493  ;;  %v708_v14 = vmul.f32 %v3225_v36, %v680_v23 }
 0x189   :  { %v3154_v40 = vpop.permute.xlu0 %497 }
 0x18b   :  { %v3156_v41 = vpop.permute.xlu1 %501 }
 0x18d   :  { %v3158_v43 = vpop.permute.xlu0 %433 }
 0x18f   :  { %v3160_v45 = vpop.permute.xlu1 %437 }
 0x191   :  { %v3162_v47 = vpop.permute.xlu0 %441 }
 0x193   :  { %v3164_v49 = vpop.permute.xlu1 %445 }
 0x195   :  { %v3166_v50 = vpop.permute.xlu0 %377 }
 0x197   :  { %v3168_v51 = vpop.permute.xlu1 %381 }
 0x199   :  { %v3170_v52 = vpop.permute.xlu0 %385 }
 0x19b   :  { %v3172_v53 = vpop.permute.xlu1 %389 }
 0x19d   :  { %v3174_v54 = vpop.permute.xlu0 %320 }
 0x19f   :  { %v3176_v55 = vpop.permute.xlu1 %324 }
 0x1a1   :  { %v3178_v56 = vpop.permute.xlu0 %328 }
 0x1a3   :  { %v3180_v58 = vpop.permute.xlu1 %332 }
 0x1a5   :  { %v3182_v59 = vpop.permute.xlu0 %713 }
 0x1a7   :  { %v3184_v61 = vpop.permute.xlu1 %717 }
 0x1a9   :  { %v668_v62 = vpop.permute.xlu0 %667 }
 0x1ab   :  { %v660_v2 = vpop.permute.xlu1 %659 }
 0x1ad   :  { %v604_v5 = vpop.permute.xlu0 %603 }
 0x1af   :  { %v664_v8 = vpop.permute.xlu1 %663 }
 0x1b0   :  { %v677_v12 = vsel %vm673_vm3, %v664_v8, %v668_v62  ;;  %v679_v13 = vsel %vm673_vm3, %v660_v2, %v664_v8 }
 0x1b1   :  { %v709_v17 = vmul.f32 %v3197_v6, %v679_v13  ;;  %v612_v19 = vpop.permute.xlu0 %611  ;;  %v710_v22 = vmul.f32 %v3202_v9, %v677_v12 }
 0x1b3   :  { %v672_v29 = vpop.permute.xlu1 %671  ;;  %786 = vmatprep.subr.mxu0 %v710_v22 }
 0x1b4   :  { %v675_v8 = vsel %vm673_vm3, %v668_v62, %v672_v29  ;;  %v681_v11 = vsel %vm673_vm3, %v672_v29, %v660_v2  ;;  %787 = vmatpush1.msra.mxu0 %v709_v17  ;;  %v3249_v62 = vrot.slane %v2492_v60, %v3188_v1  ;;  %v3253_v17 = vrot.slane %v2492_v60, %v3190_v3 }
 0x1b5   :  { %v711_v12 = vmul.f32 %v3221_v26, %v675_v8  ;;  %788 = vmatprep.subr.mxu0 %v706_v33  ;;  %v3244_v21 = vpop.permute.xlu0 %547  ;;  %v712_v13 = vmul.f32 %v3225_v36, %v681_v11  ;;  %v622_v33 = vsel %vm617_vm4, %v3121_v27, %v3123_v28  ;;  %v3271_v11 = vrot.slane %v2492_v60, %v3199_v7 }
 0x1b6   :  { %789 = vmatpush1.msra.mxu0 %v705_v57  ;;  %v624_v28 = vsel %vm617_vm4, %v3132_v31, %v3121_v27 }
 0x1b7   :  { %863 = vmatprep.subr.mxu1 %v712_v13  ;;  %v608_v2 = vpop.permute.xlu1 %607 }
 0x1b8   :  { %v621_v22 = vsel %vm617_vm4, %v608_v2, %v612_v19  ;;  %v623_v29 = vsel %vm617_vm4, %v604_v5, %v608_v2  ;;  %864 = vmatpush1.msra.mxu1 %v711_v12  ;;  %v650_v12 = vmul.f32 %v3253_v17, %v620_v25  ;;  %v649_v2 = vmul.f32 %v3249_v62, %v622_v33 }
 0x1b9   :  { %v653_v57 = vmul.f32 %v3249_v62, %v623_v29  ;;  %865 = vmatprep.subr.mxu1 %v708_v14  ;;  %v556_v23 = vpop.permute.xlu0 %555  ;;  %v654_v8 = vmul.f32 %v3253_v17, %v621_v22  ;;  %v2491_v14 = vld [vmem:[%s4244_s1 + $0x14] sm:$0xf]  ;;  %v618_v25 = vsel %vm617_vm4, %v3130_v30, %v3132_v31  ;;  %v652_v30 = vmul.f32 %v3274_v4, %v624_v28 }
 0x1ba   :  { %866 = vmatpush1.msra.mxu1 %v707_v24  ;;  %v651_v31 = vmul.f32 %v3271_v11, %v618_v25  ;;  %v3325_v25 = vrot.slane %v2491_v14, %v3204_v10 }
 0x1bb   :  { %v616_v13 = vpop.permute.xlu1 %615  ;;  %790 = vmatprep.subr.mxu0 %v654_v8 }
 0x1bc   :  { %v619_v24 = vsel %vm617_vm4, %v612_v19, %v616_v13  ;;  %v625_v60 = vsel %vm617_vm4, %v616_v13, %v604_v5  ;;  %791 = vmatpush1.msra.mxu0 %v653_v57  ;;  %v3299_v19 = vrot.slane %v2491_v14, %v3188_v1  ;;  %v3302_v5 = vrot.slane %v2491_v14, %v3190_v3 }
 0x1bd   :  { %v655_v22 = vmul.f32 %v3271_v11, %v619_v24  ;;  %v656_v27 = vmul.f32 %v3274_v4, %v625_v60  ;;  %792 = vmatprep.subr.mxu0 %v650_v12  ;;  %v3295_v29 = vpop.permute.xlu0 %491  ;;  %v564_v57 = vsel %vm561_vm5, %v3141_v34, %v3143_v35  ;;  %v566_v12 = vsel %vm561_vm5, %v3136_v32, %v3141_v34 }
 0x1be   :  { %793 = vmatpush1.msra.mxu0 %v649_v2  ;;  %v3322_v60 = vrot.slane %v2491_v14, %v3199_v7  ;;  %v568_v34 = vsel %vm561_vm5, %v3148_v37, %v3136_v32 }
 0x1bf   :  { %v552_v33 = vpop.permute.xlu1 %551  ;;  %867 = vmatprep.subr.mxu1 %v656_v27 }
 0x1c0   :  { %v565_v8 = vsel %vm561_vm5, %v552_v33, %v556_v23  ;;  %v567_v13 = vsel %vm561_vm5, %v3244_v21, %v552_v33  ;;  %868 = vmatpush1.msra.mxu1 %v655_v22  ;;  %v594_v22 = vmul.f32 %v3302_v5, %v564_v57  ;;  %v593_v33 = vmul.f32 %v3299_v19, %v566_v12 }
 0x1c1   :  { %v597_v2 = vmul.f32 %v3299_v19, %v567_v13  ;;  %v598_v28 = vmul.f32 %v3302_v5, %v565_v8  ;;  %869 = vmatprep.subr.mxu1 %v652_v30  ;;  %v500_v24 = vpop.permute.xlu0 %499  ;;  %v2490_v30 = vld [vmem:[%s4244_s1 + $0xc] sm:$0xf]  ;;  %v562_v57 = vsel %vm561_vm5, %v3143_v35, %v3148_v37  ;;  %v596_v12 = vmul.f32 %v3325_v25, %v568_v34 }
 0x1c2   :  { %870 = vmatpush1.msra.mxu1 %v651_v31  ;;  %v595_v35 = vmul.f32 %v3322_v60, %v562_v57  ;;  %v512_v34 = vsel %vm505_vm6, %v3156_v41, %v3150_v38 }
 0x1c3   :  { %v560_v27 = vpop.permute.xlu1 %559  ;;  %794 = vmatprep.subr.mxu0 %v598_v28 }
 0x1c4   :  { %v563_v31 = vsel %vm561_vm5, %v556_v23, %v560_v27  ;;  %v569_v14 = vsel %vm561_vm5, %v560_v27, %v3244_v21  ;;  %795 = vmatpush1.msra.mxu0 %v597_v2  ;;  %v3351_v23 = vrot.slane %v2490_v30, %v3190_v3  ;;  %v3366_v27 = vrot.slane %v2490_v30, %v3188_v1 }
 0x1c5   :  { %v599_v8 = vmul.f32 %v3322_v60, %v563_v31  ;;  %v600_v32 = vmul.f32 %v3325_v25, %v569_v14  ;;  %796 = vmatprep.subr.mxu0 %v594_v22  ;;  %v3347_v13 = vpop.permute.xlu0 %435  ;;  %v2489_v31 = vld [vmem:[%s4244_s1 + $0x8] sm:$0xf]  ;;  %v508_v14 = vsel %vm505_vm6, %v3152_v39, %v3154_v40 }
 0x1c6   :  { %797 = vmatpush1.msra.mxu0 %v593_v33 }
 0x1c7   :  { %v496_v21 = vpop.permute.xlu1 %495  ;;  %798 = vmatprep.subr.mxu0 %v3040_v18  ;;  %871 = vmatprep.subr.mxu1 %v600_v32  ;;  %v3363_v18 = vrot.slane %v2490_v30, %v3199_v7 }
 0x1c8   :  { %v511_v37 = vsel %vm505_vm6, %v3295_v29, %v496_v21  ;;  %799 = vmatpush1.msra.mxu0 %v3033_v16  ;;  %872 = vmatpush1.msra.mxu1 %v599_v8  ;;  %v510_v16 = vsel %vm505_vm6, %v3150_v38, %v3152_v39  ;;  %v509_v22 = vsel %vm505_vm6, %v496_v21, %v500_v24 }
 0x1c9   :  { %v542_v2 = vmul.f32 %v3351_v23, %v511_v37  ;;  %800 = vmatprep.subr.mxu0 %v2947_v44  ;;  %873 = vmatprep.subr.mxu1 %v596_v12  ;;  %v444_v28 = vpop.permute.xlu0 %443  ;;  %v3376_v44 = vrot.slane %v2490_v30, %v3204_v10  ;;  %v3411_v39 = vrot.slane %v2489_v31, %v3190_v3 }
 0x1ca   :  { %801 = vmatpush1.msra.mxu0 %v2945_v42  ;;  %874 = vmatpush1.msra.mxu1 %v595_v35  ;;  %v506_v42 = vsel %vm505_vm6, %v3154_v40, %v3156_v41  ;;  %v539_v8 = vmul.f32 %v3363_v18, %v508_v14  ;;  %v3420_v12 = vrot.slane %v2489_v31, %v3199_v7 }
 0x1cb   :  { %v504_v33 = vpop.permute.xlu1 %503  ;;  %802 = vmatprep.subr.mxu0 %v542_v2  ;;  %875 = vmatprep.subr.mxu1 %v3047_v20  ;;  %v454_v35 = vsel %vm449_vm7, %v3158_v43, %v3160_v45  ;;  %v3427_v37 = vrot.slane %v2489_v31, %v3188_v1 }
 0x1cc   :  { %v507_v30 = vsel %vm505_vm6, %v500_v24, %v504_v33  ;;  %v513_v20 = vsel %vm505_vm6, %v504_v33, %v3295_v29  ;;  %876 = vmatpush1.msra.mxu1 %v3028_v15  ;;  %v543_v24 = vmul.f32 %v3363_v18, %v509_v22  ;;  %v538_v29 = vmul.f32 %v3351_v23, %v510_v16 }
 0x1cd   :  { %v541_v38 = vmul.f32 %v3366_v27, %v513_v20  ;;  %v544_v41 = vmul.f32 %v3376_v44, %v507_v30  ;;  %877 = vmatprep.subr.mxu1 %v2955_v48  ;;  %v3403_v57 = vpop.permute.xlu0 %379  ;;  %v537_v15 = vmul.f32 %v3366_v27, %v512_v34  ;;  %v540_v48 = vmul.f32 %v3376_v44, %v506_v42  ;;  %v2488_v34 = vld [vmem:[%s4244_s1 + $0x4] sm:$0xf] }
 0x1ce   :  { %878 = vmatpush1.msra.mxu1 %v2951_v46  ;;  %4301 = vst [vmem:[#allocation5_spill] sm:$0xff] %v3420_v12  ;;  %v3432_v16 = vrot.slane %v2489_v31, %v3204_v10  ;;  %v450_v33 = vsel %vm449_vm7, %v3162_v47, %v3164_v49  ;;  %v456_v42 = vsel %vm449_vm7, %v3164_v49, %v3158_v43 }
 0x1cf   :  { %v440_v40 = vpop.permute.xlu1 %439  ;;  %803 = vmatpush1.msra.mxu0 %v541_v38  ;;  %879 = vmatprep.subr.mxu1 %v544_v41  ;;  %v452_v20 = vsel %vm449_vm7, %v3160_v45, %v3162_v47  ;;  %v482_v41 = vmul.f32 %v3411_v39, %v454_v35  ;;  %v3484_v35 = vrot.slane %v2488_v34, %v3204_v10 }
 0x1d0   :  { %v455_v46 = vsel %vm449_vm7, %v3347_v13, %v440_v40  ;;  %804 = vmatprep.subr.mxu0 %v538_v29  ;;  %880 = vmatpush1.msra.mxu1 %v543_v24  ;;  %v453_v2 = vsel %vm449_vm7, %v440_v40, %v444_v28  ;;  %4302 = vst [vmem:[#allocation6_spill] sm:$0xff] %v3432_v16 }
 0x1d1   :  { %v486_v32 = vmul.f32 %v3411_v39, %v455_v46  ;;  %805 = vmatpush1.msra.mxu0 %v537_v15  ;;  %881 = vmatprep.subr.mxu1 %v540_v48  ;;  %v388_v21 = vpop.permute.xlu0 %387  ;;  %v487_v38 = vmul.f32 %v3420_v12, %v453_v2  ;;  %v484_v45 = vmul.f32 %v3432_v16, %v450_v33 }
 0x1d2   :  { %882 = vmatpush1.msra.mxu1 %v539_v8  ;;  %v483_v47 = vmul.f32 %v3420_v12, %v452_v20  ;;  %v3472_v48 = vrot.slane %v2488_v34, %v3199_v7  ;;  %v398_v8 = vsel %vm393_vm8, %v3166_v50, %v3168_v51  ;;  %v3479_v46 = vrot.slane %v2488_v34, %v3188_v1 }
 0x1d3   :  { %v448_v22 = vpop.permute.xlu1 %447  ;;  %806 = vmatprep.subr.mxu0 %v486_v32  ;;  %4306 = vst [vmem:[#allocation10_spill] sm:$0xff] %v3484_v35  ;;  %v400_v33 = vsel %vm393_vm8, %v3172_v53, %v3166_v50 }
 0x1d4   :  { %v451_v31 = vsel %vm449_vm7, %v444_v28, %v448_v22  ;;  %v457_v30 = vsel %vm449_vm7, %v448_v22, %v3347_v13  ;;  %v481_v28 = vmul.f32 %v3427_v37, %v456_v42  ;;  %v3463_v13 = vrot.slane %v2488_v34, %v3190_v3  ;;  %4304 = vst [vmem:[#allocation8_spill] sm:$0xff] %v3472_v48  ;;  %v347_v42 = vld [vmem:[%s4244_s1] sm:$0xf] }
 0x1d5   :  { %v485_v14 = vmul.f32 %v3427_v37, %v457_v30  ;;  %v488_v43 = vmul.f32 %v3432_v16, %v451_v31  ;;  %v3456_v49 = vpop.permute.xlu0 %322  ;;  %4305 = vst [vmem:[#allocation9_spill] sm:$0xff] %v3479_v46  ;;  %v394_v22 = vsel %vm393_vm8, %v3170_v52, %v3172_v53  ;;  %v396_v30 = vsel %vm393_vm8, %v3168_v51, %v3170_v52 }
 0x1d6   :  { %4303 = vst [vmem:[#allocation7_spill] sm:$0xff] %v3463_v13  ;;  %v428_v51 = vmul.f32 %v3484_v35, %v394_v22  ;;  %v427_v52 = vmul.f32 %v3472_v48, %v396_v30 }
 0x1d7   :  { %v384_v24 = vpop.permute.xlu1 %383  ;;  %807 = vmatpush1.msra.mxu0 %v485_v14  ;;  %883 = vmatprep.subr.mxu1 %v488_v43  ;;  %v426_v43 = vmul.f32 %v3463_v13, %v398_v8  ;;  %v341_v8 = vsel %vm338_vm9, %v3176_v55, %v3178_v56 }
 0x1d8   :  { %v399_v29 = vsel %vm393_vm8, %v3403_v57, %v384_v24  ;;  %808 = vmatprep.subr.mxu0 %v482_v41  ;;  %884 = vmatpush1.msra.mxu1 %v487_v38  ;;  %v397_v32 = vsel %vm393_vm8, %v384_v24, %v388_v21 }
 0x1d9   :  { %v430_v15 = vmul.f32 %v3463_v13, %v399_v29  ;;  %809 = vmatpush1.msra.mxu0 %v481_v28  ;;  %885 = vmatprep.subr.mxu1 %v484_v45  ;;  %v331_v40 = vpop.permute.xlu0 %330  ;;  %v431_v14 = vmul.f32 %v3472_v48, %v397_v32  ;;  %v3524_v45 = vrot.slane %v347_v42, %v3199_v7  ;;  %v2494_v29 = vld [vmem:[%s4244_s1 + $0x20] sm:$0xf] }
 0x1da   :  { %886 = vmatpush1.msra.mxu1 %v483_v47  ;;  %v3527_v47 = vrot.slane %v347_v42, %v3188_v1 }
 0x1db   :  { %v392_v2 = vpop.permute.xlu1 %391  ;;  %810 = vmatprep.subr.mxu0 %v430_v15  ;;  %4308 = vst [vmem:[#allocation12_spill] sm:$0xff] %v3524_v45  ;;  %v343_v15 = vsel %vm338_vm9, %v3174_v54, %v3176_v55 }
 0x1dc   :  { %v395_v34 = vsel %vm393_vm8, %v388_v21, %v392_v2  ;;  %v401_v31 = vsel %vm393_vm8, %v392_v2, %v3403_v57  ;;  %v425_v21 = vmul.f32 %v3479_v46, %v400_v33  ;;  %v3515_v57 = vrot.slane %v347_v42, %v3190_v3  ;;  %4309 = vst [vmem:[#allocation13_spill] sm:$0xff] %v3527_v47 }
 0x1dd   :  { %v429_v20 = vmul.f32 %v3479_v46, %v401_v31  ;;  %v432_v50 = vmul.f32 %v3484_v35, %v395_v34  ;;  %v3508_v53 = vpop.permute.xlu0 %715  ;;  %v3544_v2 = vrot.slane %v347_v42, %v3204_v10  ;;  %v339_v33 = vsel %vm338_vm9, %v3178_v56, %v3180_v58 }
 0x1de   :  { %4307 = vst [vmem:[#allocation11_spill] sm:$0xff] %v3515_v57  ;;  %v345_v34 = vsel %vm338_vm9, %v3180_v58, %v3174_v54  ;;  %v3560_v31 = vrot.slane %v2494_v29, %v3188_v1  ;;  %v3565_v56 = vrot.slane %v2494_v29, %v3190_v3  ;;  %v370_v58 = vmul.f32 %v3515_v57, %v343_v15 }
 0x1df   :  { %v327_v38 = vpop.permute.xlu1 %326  ;;  %811 = vmatpush1.msra.mxu0 %v429_v20  ;;  %887 = vmatprep.subr.mxu1 %v432_v50  ;;  %4310 = vst [vmem:[#allocation14_spill] sm:$0xff] %v3544_v2  ;;  %v371_v1 = vmul.f32 %v3524_v45, %v341_v8  ;;  %v372_v3 = vmul.f32 %v3544_v2, %v339_v33  ;;  %v73_v8 = vld [vmem:[%s4248_s5] sm:$0xff]  ;;  %v76_v33 = vld [vmem:[%s4248_s5 + $0x18] sm:$0xf] }
 0x1e0   :  { %v344_v41 = vsel %vm338_vm9, %v3456_v49, %v327_v38  ;;  %812 = vmatprep.subr.mxu0 %v426_v43  ;;  %888 = vmatpush1.msra.mxu1 %v431_v14  ;;  %v342_v32 = vsel %vm338_vm9, %v327_v38, %v331_v40  ;;  %4311 = vst [vmem:[#allocation15_spill] sm:$0xff] %v3560_v31  ;;  %4312 = vst [vmem:[#allocation16_spill] sm:$0xff] %v3565_v56 }
 0x1e1   :  { %v374_v28 = vmul.f32 %v3515_v57, %v344_v41  ;;  %813 = vmatpush1.msra.mxu0 %v425_v21  ;;  %889 = vmatprep.subr.mxu1 %v428_v51  ;;  %v724_v24 = vpop.permute.xlu0 %723  ;;  %v375_v54 = vmul.f32 %v3524_v45, %v342_v32  ;;  %v369_v14 = vmul.f32 %v3527_v47, %v345_v34 }
 0x1e2   :  { %890 = vmatpush1.msra.mxu1 %v427_v52  ;;  %v734_v38 = vsel %vm729_vm10, %v3182_v59, %v3184_v61 }
 0x1e3   :  { %v335_v22 = vpop.permute.xlu1 %334  ;;  %814 = vmatprep.subr.mxu0 %v374_v28 }
 0x1e4   :  { %v340_v55 = vsel %vm338_vm9, %v331_v40, %v335_v22  ;;  %v346_v42 = vsel %vm338_vm9, %v335_v22, %v3456_v49  ;;  %v3570_v40 = vrot.slane %v2494_v29, %v3199_v7  ;;  %v3573_v49 = vrot.slane %v2494_v29, %v3204_v10 }
 0x1e5   :  { %v373_v30 = vmul.f32 %v3527_v47, %v346_v42  ;;  %v376_v20 = vmul.f32 %v3544_v2, %v340_v55  ;;  %v722_v50 = vpop.permute.xlu0 %721  ;;  %v761_v29 = vmul.f32 %v3560_v31, %v734_v38  ;;  %v75_v55 = vld [vmem:[%s4248_s5 + $0x10] sm:$0xf] }
 0x1e6   :  { %4313 = vst [vmem:[#allocation17_spill] sm:$0xff] %v3570_v40  ;;  %4314 = vst [vmem:[#allocation18_spill] sm:$0xff] %v3573_v49  ;;  %v732_v21 = vsel %vm729_vm10, %v3184_v61, %v722_v50 }
 0x1e7   :  { %v720_v43 = vpop.permute.xlu1 %719  ;;  %815 = vmatpush1.msra.mxu0 %v373_v30  ;;  %891 = vmatprep.subr.mxu1 %v376_v20  ;;  %v762_v41 = vmul.f32 %v3565_v56, %v732_v21 }
 0x1e8   :  { %v733_v7 = vsel %vm729_vm10, %v720_v43, %v724_v24  ;;  %v735_v10 = vsel %vm729_vm10, %v3508_v53, %v720_v43  ;;  %816 = vmatprep.subr.mxu0 %v370_v58  ;;  %892 = vmatpush1.msra.mxu1 %v375_v54 }
 0x1e9   :  { %v765_v51 = vmul.f32 %v3560_v31, %v735_v10  ;;  %v766_v52 = vmul.f32 %v3565_v56, %v733_v7  ;;  %817 = vmatpush1.msra.mxu0 %v369_v14  ;;  %893 = vmatprep.subr.mxu1 %v372_v3 }
 0x1ea   :  { %894 = vmatpush1.msra.mxu1 %v371_v1 }
 0x1eb   :  { %v728_v28 = vpop.permute.xlu1 %727  ;;  %846 = vmatprep.subr.mxu0 %v766_v52 }
 0x1ec   :  { %v731_v15 = vsel %vm729_vm10, %v724_v24, %v728_v28  ;;  %v737_v61 = vsel %vm729_vm10, %v728_v28, %v3508_v53  ;;  %847 = vmatpush2.msra.mxu0 %v765_v51 }
 0x1ed   :  { %v767_v32 = vmul.f32 %v3570_v40, %v731_v15  ;;  %v768_v22 = vmul.f32 %v3573_v49, %v737_v61  ;;  %848 = vmatprep.subr.mxu0 %v762_v41 }
 0x1ee   :  { %849 = vmatpush2.msra.mxu0 %v761_v29 }
 0x1ef   :  { %v726_v24 = vpop.permute.xlu1 %725  ;;  %851 = vmatmul.mubr.f32.vlgmr.msra.gmra.mxu0 %v73_v8  ;;  %923 = vmatprep.subr.mxu1 %v768_v22 }
 0x1f0   :  { %v730_v53 = vsel %vm729_vm10, %v722_v50, %v726_v24  ;;  %v736_v34 = vsel %vm729_vm10, %v726_v24, %v3182_v59  ;;  %924 = vmatpush2.msra.mxu1 %v767_v32  ;;  %2496 = vmatprep.mubr.msk.f32.mxu0 %vm779_vm2, %v76_v33 }
 0x1f1   :  { %v763_v42 = vmul.f32 %v3570_v40, %v730_v53  ;;  %v764_v30 = vmul.f32 %v3573_v49, %v736_v34 }
 0x1f2   :  { %v777_v14 = vpop.permute.xlu0 %776 }
 0x1f3   :  { %857 = vmatmul.mubr.f32.gmra.mxu0 %v75_v55  ;;  %925 = vmatprep.subr.mxu1 %v764_v30 }
 0x1f4   :  { %926 = vmatpush2.msra.mxu1 %v763_v42  ;;  %1077 = vmatprep.mubr.f32.mxu0 %v4259_v0 }
 0x1f5   :  { %928 = vmatmul.mubr.f32.vlgmr.msra.gmra.mxu1 %v73_v8 }
 0x1f6   :  { %2498 = vmatprep.mubr.msk.f32.mxu1 %vm779_vm2, %v76_v33 }
 0x1f9   :  { %934 = vmatmul.mubr.f32.gmra.mxu1 %v75_v55 }
 0x1fa   :  { %1148 = vmatprep.mubr.f32.mxu1 %v4259_v0 }
 0x1fc   :  { %v772_v59 = vpop.permute.xlu1 %771 }
 0x2af   :  { %v852_v20 = vpop.f32.mrf.mxu0 }
 0x2b0   :  { %v3621_v50 = vadd.f32 %v852_v20, %v772_v59 }
 0x2b1   :  { %v854_v54 = vpop.f32.mrf.mxu0 }
 0x2b2   :  { %v940_v58 = vsub.f32 0.0, %v3621_v50  ;;  %v3624_v1 = vadd.f32 %v854_v54, %v772_v59 }
 0x2b3   :  { %v858_v43 = vpop.f32.mrf.mxu0 }
 0x2b4   :  { %v948_v3 = vmin.f32 %v940_v58, 30.0  ;;  %v941_v21 = vsub.f32 0.0, %v3624_v1  ;;  %v3627_v7 = vadd.f32 %v858_v43, %v777_v14 }
 0x2b5   :  { %v860_v10 = vpop.f32.mrf.mxu0  ;;  %v929_v38 = vpop.f32.mrf.mxu1 }
 0x2b6   :  { %v949_v51 = vmin.f32 %v941_v21, 30.0  ;;  %v944_v52 = vsub.f32 0.0, %v3627_v7  ;;  %v3630_v41 = vadd.f32 %v860_v10, %v777_v14  ;;  %v956_v28 = vmul.f32 1.442695, %v948_v3 }
 0x2b7   :  { %v3632_v29 = vadd.f32 %v929_v38, %v772_v59  ;;  %v931_v15 = vpop.f32.mrf.mxu1 }
 0x2b8   :  { %v958_v61 = vmul.f32 1.442695, %v949_v51  ;;  %v952_v8 = vmin.f32 %v944_v52, 30.0  ;;  %v945_v32 = vsub.f32 0.0, %v3630_v41  ;;  %v3636_v33 = vadd.f32 %v931_v15, %v772_v59 }
 0x2b9   :  { %v942_v22 = vsub.f32 0.0, %v3632_v29  ;;  %v935_v24 = vpop.f32.mrf.mxu1 }
 0x2ba   :  { %2688 = vpow2.f32 %v958_v61  ;;  %v964_v53 = vmul.f32 1.442695, %v952_v8  ;;  %v953_v34 = vmin.f32 %v945_v32, 30.0  ;;  %v3638_v55 = vadd.f32 %v935_v24, %v777_v14 }
 0x2bb   :  { %2690 = vpow2.f32 %v956_v28  ;;  %v950_v42 = vmin.f32 %v942_v22, 30.0  ;;  %v943_v30 = vsub.f32 0.0, %v3636_v33  ;;  %v937_v20 = vpop.f32.mrf.mxu1 }
 0x2bc   :  { %2692 = vpow2.f32 %v964_v53  ;;  %v966_v54 = vmul.f32 1.442695, %v953_v34  ;;  %v946_v58 = vsub.f32 0.0, %v3638_v55  ;;  %v938_v43 = vadd.f32 %v937_v20, %v777_v14 }
 0x2bd   :  { %v960_v3 = vmul.f32 1.442695, %v950_v42  ;;  %v951_v21 = vmin.f32 %v943_v30, 30.0 }
 0x2be   :  { %2694 = vpow2.f32 %v966_v54  ;;  %v954_v59 = vmin.f32 %v946_v58, 30.0  ;;  %v947_v10 = vsub.f32 0.0, %v938_v43 }
 0x2bf   :  { %v962_v38 = vmul.f32 1.442695, %v951_v21  ;;  %2696 = vpow2.f32 %v960_v3 }
 0x2c0   :  { %v968_v51 = vmul.f32 1.442695, %v954_v59  ;;  %v955_v52 = vmin.f32 %v947_v10, 30.0 }
 0x2c1   :  { %2698 = vpow2.f32 %v962_v38 }
 0x2c2   :  { %2700 = vpow2.f32 %v968_v51  ;;  %v970_v28 = vmul.f32 1.442695, %v955_v52 }
 0x2c4   :  { %2702 = vpow2.f32 %v970_v28 }
 0x2c7   :  { %v2689_v15 = vpop.eup %2688 }
 0x2c8   :  { %v2691_v61 = vpop.eup %2690  ;;  %v973_v8 = vadd.f32 1.0, %v2689_v15 }
 0x2c9   :  { %v2693_v32 = vpop.eup %2692  ;;  %v972_v14 = vadd.f32 1.0, %v2691_v61 }
 0x2ca   :  { %v976_v22 = vadd.f32 1.0, %v2693_v32  ;;  %2704 = vrcp.f32 %v973_v8  ;;  %v79_v32 = vld [vmem:[%s4250_s7] sm:$0x3f] }
 0x2cb   :  { %v2695_v24 = vpop.eup %2694 }
 0x2cc   :  { %v977_v53 = vadd.f32 1.0, %v2695_v24  ;;  %v2697_v34 = vpop.eup %2696  ;;  %2706 = vrcp.f32 %v976_v22 }
 0x2cd   :  { %v974_v3 = vadd.f32 1.0, %v2697_v34 }
 0x2ce   :  { %v2699_v42 = vpop.eup %2698  ;;  %2708 = vrcp.f32 %v977_v53 }
 0x2cf   :  { %v2701_v30 = vpop.eup %2700  ;;  %2710 = vrcp.f32 %v972_v14  ;;  %v975_v20 = vadd.f32 1.0, %v2699_v42  ;;  %v1159_v42 = vld [vmem:[%s4251_s8] sm:$0xff] }
 0x2d0   :  { %v978_v54 = vadd.f32 1.0, %v2701_v30 }
 0x2d1   :  { %v2703_v58 = vpop.eup %2702  ;;  %2712 = vrcp.f32 %v975_v20 }
 0x2d2   :  { %v979_v21 = vadd.f32 1.0, %v2703_v58  ;;  %2714 = vrcp.f32 %v978_v54  ;;  %v1160_v54 = vld [vmem:[%s4251_s8 + $0x8] sm:$0xff]  ;;  %v2786_v58 = vld [vmem:[%s4243_s0 + $0x18] sm:$0x3f] }
 0x2d4   :  { %2716 = vrcp.f32 %v979_v21  ;;  %v2787_v21 = vld [vmem:[%s4243_s0 + $0x10] sm:$0x3f] }
 0x2d5   :  { %2718 = vrcp.f32 %v974_v3 }
 0x2d7   :  { %v2705_v59 = vpop.eup %2704 }
 0x2d8   :  { %v989_v15 = vmul.f32 %v2705_v59, %v3624_v1 }
 0x2d9   :  { %v2707_v10 = vpop.eup %2706 }
 0x2da   :  { %v992_v28 = vmul.f32 %v2707_v10, %v3627_v7  ;;  %v1173_v10 = vpop.permute.xlu1 %1172 }
 0x2db   :  { %v2709_v38 = vpop.eup %2708 }
 0x2dc   :  { %v2711_v51 = vpop.eup %2710  ;;  %v993_v52 = vmul.f32 %v2709_v38, %v3630_v41 }
 0x2dd   :  { %v988_v8 = vmul.f32 %v2711_v51, %v3621_v50 }
 0x2de   :  { %2499 = vmatprep.subr.msk.mxu0 %vm1000_vm11, %v993_v52  ;;  %v2713_v61 = vpop.eup %2712 }
 0x2df   :  { %2500 = vmatpush1.msk.msra.mxu0 %vm1000_vm11, %v992_v28  ;;  %v2715_v22 = vpop.eup %2714  ;;  %v991_v50 = vmul.f32 %v2713_v61, %v3636_v33 }
 0x2e0   :  { %1043 = vmatprep.subr.mxu0 %v989_v15  ;;  %v994_v1 = vmul.f32 %v2715_v22, %v3638_v55  ;;  %v2784_v55 = vld [vmem:[%s4243_s0] sm:$0x3f] }
 0x2e1   :  { %v2717_v24 = vpop.eup %2716  ;;  %1044 = vmatpush1.msra.mxu0 %v988_v8 }
 0x2e2   :  { %v2719_v41 = vpop.eup %2718  ;;  %v995_v7 = vmul.f32 %v2717_v24, %v938_v43  ;;  %2501 = vmatmul.mubr.msk.f32.vlgmr.msra.gmra.mxu0 %vm996_vm12, %v79_v32 }
 0x2e3   :  { %1262 = vmatprep.mubr.f32.mxu0 %v4259_v0  ;;  %v990_v14 = vmul.f32 %v2719_v41, %v3632_v29  ;;  %v2785_v29 = vld [vmem:[%s4243_s0 + $0x8] sm:$0x3f] }
 0x2e4   :  { %2502 = vmatprep.subr.msk.mxu1 %vm1000_vm11, %v995_v7 }
 0x2e5   :  { %2503 = vmatpush1.msk.msra.mxu1 %vm1000_vm11, %v994_v1 }
 0x2e6   :  { %1114 = vmatprep.subr.mxu1 %v991_v50 }
 0x2e7   :  { %1115 = vmatpush1.msra.mxu1 %v990_v14 }
 0x2e8   :  { %2504 = vmatmul.mubr.msk.f32.vlgmr.msra.gmra.mxu1 %vm996_vm12, %v79_v32 }
 0x2e9   :  { %1339 = vmatprep.mubr.f32.mxu1 %v4259_v0 }
 0x3a2   :  { %v1079_v43 = vpop.f32.mrf.mxu0 }
 0x3a3   :  { %v3663_v53 = vadd.f32 %v2784_v55, %v1079_v43 }
 0x3a4   :  { %v1081_v33 = vpop.f32.mrf.mxu0 }
 0x3a5   :  { %4315 = vst [vmem:[#allocation19_spill] sm:$0xff] %v3663_v53  ;;  %v3668_v34 = vadd.f32 %v2785_v29, %v1081_v33 }
 0x3a7   :  { %4316 = vst [vmem:[#allocation20_spill] sm:$0xff] %v3668_v34  ;;  %2505 = vmatprep.subr.msk.mxu0 %vm97_vm0, %v3668_v34 }
 0x3a8   :  { %v1150_v30 = vpop.f32.mrf.mxu1  ;;  %2506 = vmatpush1.msk.msra.mxu0 %vm97_vm0, %v3663_v53 }
 0x3a9   :  { %2507 = vmatmul.mubr.msk.f32.vlgmr.msra.gmra.mxu0 %vm90_vm1, %v1159_v42  ;;  %v3690_v59 = vadd.f32 %v2787_v21, %v1150_v30 }
 0x3aa   :  { %v1152_v20 = vpop.f32.mrf.mxu1  ;;  %1268 = vmatprep.mubr.f32.mxu0 %v4259_v0 }
 0x3ab   :  { %v3685_v3 = vadd.f32 %v2786_v58, %v1152_v20  ;;  %4318 = vst [vmem:[#allocation22_spill] sm:$0xff] %v3690_v59 }
 0x3ad   :  { %4317 = vst [vmem:[#allocation21_spill] sm:$0xff] %v3685_v3  ;;  %2508 = vmatmul.mubr.msk.f32.gmra.mxu0 %vm90_vm1, %v1160_v54  ;;  %2509 = vmatprep.subr.msk.mxu1 %vm97_vm0, %v3685_v3 }
 0x3ae   :  { %2510 = vmatpush1.msk.msra.mxu1 %vm97_vm0, %v3690_v59 }
 0x3af   :  { %2511 = vmatmul.mubr.msk.f32.vlgmr.msra.gmra.mxu1 %vm90_vm1, %v1159_v42 }
 0x3b0   :  { %1345 = vmatprep.mubr.f32.mxu1 %v4259_v0 }
 0x3b3   :  { %2512 = vmatmul.mubr.msk.f32.gmra.mxu1 %vm90_vm1, %v1160_v54 }
 0x469   :  { %v1264_v38 = vpop.f32.mrf.mxu0 }
 0x46a   :  { %v1265_v51 = vadd.f32 %v1264_v38, %v1173_v10 }
 0x46b   :  { %v1266_v52 = vpop.f32.mrf.mxu0 }
 0x46c   :  { %v1352_v28 = vsub.f32 0.0, %v1265_v51  ;;  %v1267_v15 = vadd.f32 %v1266_v52, %v1173_v10 }
 0x46e   :  { %v1360_v61 = vmin.f32 %v1352_v28, 30.0  ;;  %v1353_v8 = vsub.f32 0.0, %v1267_v15 }
 0x46f   :  { %v1341_v32 = vpop.f32.mrf.mxu1 }
 0x470   :  { %v1368_v22 = vmul.f32 1.442695, %v1360_v61  ;;  %v1361_v24 = vmin.f32 %v1353_v8, 30.0  ;;  %v1342_v41 = vadd.f32 %v1341_v32, %v1173_v10 }
 0x471   :  { %v1343_v7 = vpop.f32.mrf.mxu1 }
 0x472   :  { %2720 = vpow2.f32 %v1368_v22  ;;  %v1370_v1 = vmul.f32 1.442695, %v1361_v24  ;;  %v1354_v50 = vsub.f32 0.0, %v1342_v41  ;;  %v1344_v14 = vadd.f32 %v1343_v7, %v1173_v10  ;;  %v1270_v24 = vpop.f32.mrf.mxu0 }
 0x474   :  { %2722 = vpow2.f32 %v1370_v1  ;;  %v1362_v43 = vmin.f32 %v1354_v50, 30.0  ;;  %v1355_v55 = vsub.f32 0.0, %v1344_v14  ;;  %v1178_v50 = vpop.permute.xlu0 %1177 }
 0x476   :  { %v1372_v33 = vmul.f32 1.442695, %v1362_v43  ;;  %v1363_v29 = vmin.f32 %v1355_v55, 30.0  ;;  %v1271_v55 = vadd.f32 %v1270_v24, %v1178_v50 }
 0x478   :  { %2724 = vpow2.f32 %v1372_v33  ;;  %v1374_v42 = vmul.f32 1.442695, %v1363_v29 }
 0x47a   :  { %2726 = vpow2.f32 %v1374_v42 }
 0x47f   :  { %v2721_v30 = vpop.eup %2720 }
 0x480   :  { %v1384_v20 = vadd.f32 1.0, %v2721_v30 }
 0x481   :  { %v2723_v54 = vpop.eup %2722 }
 0x482   :  { %2728 = vrcp.f32 %v1384_v20  ;;  %v1385_v58 = vadd.f32 1.0, %v2723_v54 }
 0x484   :  { %2730 = vrcp.f32 %v1385_v58 }
 0x485   :  { %v2725_v21 = vpop.eup %2724 }
 0x486   :  { %v1386_v38 = vadd.f32 1.0, %v2725_v21 }
 0x487   :  { %v2727_v52 = vpop.eup %2726 }
 0x488   :  { %2732 = vrcp.f32 %v1386_v38  ;;  %v1387_v28 = vadd.f32 1.0, %v2727_v52 }
 0x48a   :  { %2734 = vrcp.f32 %v1387_v28 }
 0x48f   :  { %v2729_v10 = vpop.eup %2728 }
 0x490   :  { %v3700_v61 = vmul.f32 %v2729_v10, %v1265_v51  ;;  %v1272_v51 = vpop.f32.mrf.mxu0 }
 0x491   :  { %v2731_v8 = vpop.eup %2730  ;;  %v1273_v33 = vadd.f32 %v1272_v51, %v1178_v50 }
 0x492   :  { %v3702_v32 = vmul.f32 %v2731_v8, %v1267_v15  ;;  %1600 = vrot.lane.b32.xlu0 %v3700_v61, %s2815_s3  ;;  %v1347_v15 = vpop.f32.mrf.mxu1 }
 0x493   :  { %v1348_v42 = vadd.f32 %v1347_v15, %v1178_v50 }
 0x494   :  { %1604 = vrot.lane.b32.xlu1 %v3702_v32, %s2815_s3  ;;  %v1349_v29 = vpop.f32.mrf.mxu1 }
 0x495   :  { %v2733_v22 = vpop.eup %2732  ;;  %v1350_v30 = vadd.f32 %v1349_v29, %v1178_v50  ;;  %v1358_v54 = vsub.f32 0.0, %v1348_v42 }
 0x496   :  { %v3708_v7 = vmul.f32 %v2733_v22, %v1342_v41  ;;  %v1356_v41 = vsub.f32 0.0, %v1271_v55 }
 0x497   :  { %v2735_v1 = vpop.eup %2734  ;;  %v1359_v21 = vsub.f32 0.0, %v1350_v30  ;;  %v1366_v52 = vmin.f32 %v1358_v54, 30.0 }
 0x498   :  { %v3710_v43 = vmul.f32 %v2735_v1, %v1344_v14  ;;  %1608 = vrot.lane.b32.xlu0 %v3708_v7, %s2815_s3  ;;  %v1357_v14 = vsub.f32 0.0, %v1273_v33  ;;  %v1364_v20 = vmin.f32 %v1356_v41, 30.0 }
 0x499   :  { %v1367_v10 = vmin.f32 %v1359_v21, 30.0  ;;  %v1380_v8 = vmul.f32 1.442695, %v1366_v52 }
 0x49a   :  { %1612 = vrot.lane.b32.xlu1 %v3710_v43, %s2815_s3  ;;  %v1365_v58 = vmin.f32 %v1357_v14, 30.0  ;;  %v1376_v38 = vmul.f32 1.442695, %v1364_v20 }
 0x49b   :  { %v1382_v22 = vmul.f32 1.442695, %v1367_v10 }
 0x49c   :  { %1568 = vrot.lane.b32.xlu0 %v3700_v61, %s2816_s4  ;;  %v1378_v28 = vmul.f32 1.442695, %v1365_v58  ;;  %2736 = vpow2.f32 %v1376_v38 }
 0x49e   :  { %1572 = vrot.lane.b32.xlu1 %v3702_v32, %s2816_s4  ;;  %2738 = vpow2.f32 %v1378_v28 }
 0x49f   :  { %2740 = vpow2.f32 %v1380_v8 }
 0x4a0   :  { %1576 = vrot.lane.b32.xlu0 %v3708_v7, %s2816_s4  ;;  %2742 = vpow2.f32 %v1382_v22 }
 0x4a2   :  { %1580 = vrot.lane.b32.xlu1 %v3710_v43, %s2816_s4 }
 0x4a4   :  { %1536 = vrot.lane.b32.xlu0 %v3700_v61, %s2817_s25 }
 0x4a6   :  { %1540 = vrot.lane.b32.xlu1 %v3702_v32, %s2817_s25 }
 0x4a8   :  { %1544 = vrot.lane.b32.xlu0 %v3708_v7, %s2817_s25 }
 0x4a9   :  { %v2737_v24 = vpop.eup %2736 }
 0x4aa   :  { %1548 = vrot.lane.b32.xlu1 %v3710_v43, %s2817_s25  ;;  %v1388_v50 = vadd.f32 1.0, %v2737_v24 }
 0x4ab   :  { %v2739_v1 = vpop.eup %2738 }
 0x4ac   :  { %1504 = vrot.lane.b32.xlu0 %v3700_v61, %s2818_s26  ;;  %v2741_v51 = vpop.eup %2740  ;;  %v1389_v15 = vadd.f32 1.0, %v2739_v1  ;;  %2744 = vrcp.f32 %v1388_v50 }
 0x4ad   :  { %v2743_v29 = vpop.eup %2742  ;;  %v1390_v41 = vadd.f32 1.0, %v2741_v51  ;;  %v1168_v51 = vld [vmem:[%s4254_s11 + $0x8] sm:$0xf] }
 0x4ae   :  { %1508 = vrot.lane.b32.xlu1 %v3702_v32, %s2818_s26  ;;  %2746 = vrcp.f32 %v1389_v15  ;;  %v1391_v14 = vadd.f32 1.0, %v2743_v29  ;;  %v1167_v29 = vld [vmem:[%s4254_s11] sm:$0xff] }
 0x4af   :  { %2748 = vrcp.f32 %v1390_v41 }
 0x4b0   :  { %1512 = vrot.lane.b32.xlu0 %v3708_v7, %s2818_s26  ;;  %2750 = vrcp.f32 %v1391_v14  ;;  %v2392_v14 = vld [vmem:[%s4257_s14] sm:$0x3f] }
 0x4b2   :  { %1516 = vrot.lane.b32.xlu1 %v3710_v43, %s2818_s26 }
 0x4b4   :  { %1472 = vrot.lane.b32.xlu0 %v3700_v61, %s2819_s27 }
 0x4b6   :  { %1476 = vrot.lane.b32.xlu1 %v3702_v32, %s2819_s27 }
 0x4b8   :  { %1480 = vrot.lane.b32.xlu0 %v3708_v7, %s2819_s27 }
 0x4b9   :  { %v2745_v20 = vpop.eup %2744 }
 0x4ba   :  { %1484 = vrot.lane.b32.xlu1 %v3710_v43, %s2819_s27  ;;  %v3766_v58 = vmul.f32 %v2745_v20, %v1271_v55 }
 0x4bb   :  { %v2747_v54 = vpop.eup %2746 }
 0x4bc   :  { %1440 = vrot.lane.b32.xlu0 %v3700_v61, %s2820_s28  ;;  %v2749_v21 = vpop.eup %2748  ;;  %v3770_v38 = vmul.f32 %v2747_v54, %v1273_v33 }
 0x4bd   :  { %v2751_v52 = vpop.eup %2750  ;;  %v3774_v28 = vmul.f32 %v2749_v21, %v1348_v42 }
 0x4be   :  { %1444 = vrot.lane.b32.xlu1 %v3702_v32, %s2820_s28  ;;  %v3778_v10 = vmul.f32 %v2751_v52, %v1350_v30  ;;  %v1164_v30 = vld [vmem:[%s4253_s10 + $0x8] sm:$0xff] }
 0x4bf   :  { %2513 = vmatprep.mubr.msk.f32.mxu0 %vm779_vm2, %v1164_v30  ;;  %2515 = vmatprep.mubr.msk.f32.mxu1 %vm779_vm2, %v1164_v30 }
 0x4c0   :  { %1448 = vrot.lane.b32.xlu0 %v3708_v7, %s2820_s28 }
 0x4c2   :  { %1452 = vrot.lane.b32.xlu1 %v3710_v43, %s2820_s28 }
 0x4c4   :  { %1408 = vrot.lane.b32.xlu0 %v3700_v61, %s2821_s2 }
 0x4c6   :  { %1412 = vrot.lane.b32.xlu1 %v3702_v32, %s2821_s2 }
 0x4c8   :  { %1416 = vrot.lane.b32.xlu0 %v3708_v7, %s2821_s2 }
 0x4ca   :  { %1420 = vrot.lane.b32.xlu1 %v3710_v43, %s2821_s2 }
 0x4cc   :  { %1632 = vrot.lane.b32.xlu0 %v3700_v61, %s2822_s29 }
 0x4ce   :  { %1636 = vrot.lane.b32.xlu1 %v3702_v32, %s2822_s29 }
 0x4d0   :  { %1602 = vrot.lane.b32.xlu0 %v3766_v58, %s2815_s3 }
 0x4d2   :  { %1606 = vrot.lane.b32.xlu1 %v3770_v38, %s2815_s3 }
 0x4d4   :  { %1610 = vrot.lane.b32.xlu0 %v3774_v28, %s2815_s3 }
 0x4d6   :  { %1614 = vrot.lane.b32.xlu1 %v3778_v10, %s2815_s3 }
 0x4d8   :  { %1570 = vrot.lane.b32.xlu0 %v3766_v58, %s2816_s4 }
 0x4da   :  { %1574 = vrot.lane.b32.xlu1 %v3770_v38, %s2816_s4 }
 0x4dc   :  { %1578 = vrot.lane.b32.xlu0 %v3774_v28, %s2816_s4 }
 0x4de   :  { %1582 = vrot.lane.b32.xlu1 %v3778_v10, %s2816_s4 }
 0x4e0   :  { %1538 = vrot.lane.b32.xlu0 %v3766_v58, %s2817_s25 }
 0x4e2   :  { %1542 = vrot.lane.b32.xlu1 %v3770_v38, %s2817_s25 }
 0x4e4   :  { %1546 = vrot.lane.b32.xlu0 %v3774_v28, %s2817_s25 }
 0x4e6   :  { %1550 = vrot.lane.b32.xlu1 %v3778_v10, %s2817_s25 }
 0x4e8   :  { %1506 = vrot.lane.b32.xlu0 %v3766_v58, %s2818_s26 }
 0x4ea   :  { %1510 = vrot.lane.b32.xlu1 %v3770_v38, %s2818_s26 }
 0x4ec   :  { %1514 = vrot.lane.b32.xlu0 %v3774_v28, %s2818_s26 }
 0x4ee   :  { %1518 = vrot.lane.b32.xlu1 %v3778_v10, %s2818_s26 }
 0x4f0   :  { %1474 = vrot.lane.b32.xlu0 %v3766_v58, %s2819_s27 }
 0x4f2   :  { %1478 = vrot.lane.b32.xlu1 %v3770_v38, %s2819_s27 }
 0x4f4   :  { %1482 = vrot.lane.b32.xlu0 %v3774_v28, %s2819_s27 }
 0x4f6   :  { %1486 = vrot.lane.b32.xlu1 %v3778_v10, %s2819_s27 }
 0x4f8   :  { %1442 = vrot.lane.b32.xlu0 %v3766_v58, %s2820_s28 }
 0x4fa   :  { %1446 = vrot.lane.b32.xlu1 %v3770_v38, %s2820_s28 }
 0x4fc   :  { %1450 = vrot.lane.b32.xlu0 %v3774_v28, %s2820_s28 }
 0x4fe   :  { %1454 = vrot.lane.b32.xlu1 %v3778_v10, %s2820_s28 }
 0x500   :  { %1410 = vrot.lane.b32.xlu0 %v3766_v58, %s2821_s2 }
 0x502   :  { %1414 = vrot.lane.b32.xlu1 %v3770_v38, %s2821_s2 }
 0x504   :  { %1418 = vrot.lane.b32.xlu0 %v3774_v28, %s2821_s2  ;;  %v3830_v55 = vpop.permute.xlu0 %1600 }
 0x506   :  { %v1605_v33 = vpop.permute.xlu1 %1604  ;;  %1422 = vrot.lane.b32.xlu1 %v3778_v10, %s2821_s2 }
 0x507   :  { %v3835_v42 = vsel %vm673_vm3, %v3830_v55, %v1605_v33 }
 0x508   :  { %1634 = vrot.lane.b32.xlu0 %v3766_v58, %s2822_s29 }
 0x50a   :  { %1638 = vrot.lane.b32.xlu1 %v3770_v38, %s2822_s29  ;;  %v1609_v8 = vpop.permute.xlu0 %1608 }
 0x50c   :  { %v1613_v22 = vpop.permute.xlu1 %1612  ;;  %1642 = vrot.lane.b32.xlu0 %v3774_v28, %s2822_s29 }
 0x50e   :  { %1646 = vrot.lane.b32.xlu1 %v3778_v10, %s2822_s29  ;;  %v3852_v24 = vpop.permute.xlu0 %1568 }
 0x510   :  { %v3854_v1 = vpop.permute.xlu1 %1572  ;;  %1640 = vrot.lane.b32.xlu0 %v3708_v7, %s2822_s29 }
 0x511   :  { %v3862_v50 = vsel %vm617_vm4, %v3852_v24, %v3854_v1 }
 0x512   :  { %1644 = vrot.lane.b32.xlu1 %v3710_v43, %s2822_s29  ;;  %v3869_v15 = vpop.permute.xlu0 %1576 }
 0x514   :  { %v3874_v41 = vpop.permute.xlu1 %1580  ;;  %1671 = vperm.xlu0 %2622, %v1168_v51  }
 0x516   :  { %1666 = vperm.xlu1 %2623, %v1167_v29   ;;  %v3879_v20 = vpop.permute.xlu0 %1536 }
 0x518   :  { %v3881_v54 = vpop.permute.xlu1 %1540  ;;  %2395 = vperm.xlu0 %2622, %v2392_v14  }
 0x519   :  { %v3887_v21 = vsel %vm561_vm5, %v3879_v20, %v3881_v54 }
 0x51a   :  { %v3889_v52 = vpop.permute.xlu0 %1544 }
 0x51c   :  { %v3891_v30 = vpop.permute.xlu1 %1548 }
 0x51e   :  { %v3893_v51 = vpop.permute.xlu0 %1504 }
 0x520   :  { %v1509_v0 = vpop.permute.xlu1 %1508 }
 0x521   :  { %v3898_v29 = vsel %vm505_vm6, %v3893_v51, %v1509_v0 }
 0x522   :  { %v3900_v3 = vpop.permute.xlu0 %1512 }
 0x523   :  { %v3905_v14 = vsel %vm505_vm6, %v1509_v0, %v3900_v3 }
 0x524   :  { %v3907_v59 = vpop.permute.xlu1 %1516 }
 0x526   :  { %v3909_v34 = vpop.permute.xlu0 %1472 }
 0x528   :  { %v1477_v53 = vpop.permute.xlu1 %1476 }
 0x529   :  { %v3914_v49 = vsel %vm449_vm7, %v3909_v34, %v1477_v53 }
 0x52a   :  { %4319 = vst [vmem:[#allocation23_spill] sm:$0xff] %v3914_v49  ;;  %v3916_v40 = vpop.permute.xlu0 %1480 }
 0x52b   :  { %v3921_v31 = vsel %vm449_vm7, %v1477_v53, %v3916_v40 }
 0x52c   :  { %4320 = vst [vmem:[#allocation24_spill] sm:$0xff] %v3921_v31  ;;  %v3923_v56 = vpop.permute.xlu1 %1484 }
 0x52e   :  { %v3925_v0 = vpop.permute.xlu0 %1440 }
 0x52f   :  { %4321 = vst [vmem:[#allocation25_spill] sm:$0xff] %v3925_v0 }
 0x530   :  { %v1445_v45 = vpop.permute.xlu1 %1444 }
 0x531   :  { %v3930_v2 = vsel %vm393_vm8, %v3925_v0, %v1445_v45 }
 0x532   :  { %4322 = vst [vmem:[#allocation26_spill] sm:$0xff] %v3930_v2  ;;  %v3932_v47 = vpop.permute.xlu0 %1448 }
 0x533   :  { %4323 = vst [vmem:[#allocation27_spill] sm:$0xff] %v3932_v47  ;;  %v3937_v57 = vsel %vm393_vm8, %v1445_v45, %v3932_v47 }
 0x534   :  { %4324 = vst [vmem:[#allocation28_spill] sm:$0xff] %v3937_v57  ;;  %v3939_v48 = vpop.permute.xlu1 %1452 }
 0x535   :  { %4325 = vst [vmem:[#allocation29_spill] sm:$0xff] %v3939_v48 }
 0x536   :  { %v3941_v53 = vpop.permute.xlu0 %1408 }
 0x537   :  { %4326 = vst [vmem:[#allocation30_spill] sm:$0xff] %v3941_v53 }
 0x538   :  { %v1413_v35 = vpop.permute.xlu1 %1412 }
 0x539   :  { %v3946_v46 = vsel %vm338_vm9, %v3941_v53, %v1413_v35 }
 0x53a   :  { %4327 = vst [vmem:[#allocation31_spill] sm:$0xff] %v3946_v46  ;;  %v3948_v13 = vpop.permute.xlu0 %1416  ;;  %v1618_v46 = vsel %vm673_vm3, %v1605_v33, %v1609_v8 }
 0x53b   :  { %4328 = vst [vmem:[#allocation32_spill] sm:$0xff] %v3948_v13  ;;  %v3953_v2 = vsel %vm338_vm9, %v1413_v35, %v3948_v13  ;;  %v1625_v33 = vmul.f32 %v1618_v46, %v3202_v9 }
 0x53c   :  { %4329 = vst [vmem:[#allocation33_spill] sm:$0xff] %v3953_v2  ;;  %v3955_v0 = vpop.permute.xlu1 %1420 }
 0x53d   :  { %4330 = vst [vmem:[#allocation34_spill] sm:$0xff] %v3955_v0 }
 0x53e   :  { %v3957_v45 = vpop.permute.xlu0 %1632 }
 0x53f   :  { %4331 = vst [vmem:[#allocation35_spill] sm:$0xff] %v3957_v45  ;;  %v1622_v45 = vsel %vm673_vm3, %v1613_v22, %v3830_v55 }
 0x540   :  { %v3959_v57 = vpop.permute.xlu1 %1636  ;;  %v1627_v55 = vmul.f32 %v1622_v45, %v3225_v36  ;;  %v1592_v45 = vmul.f32 %v3862_v50, %v3249_v62 }
 0x541   :  { %4332 = vst [vmem:[#allocation36_spill] sm:$0xff] %v3959_v57 }
 0x542   :  { %v1603_v47 = vpop.permute.xlu0 %1602 }
 0x544   :  { %v1607_v48 = vpop.permute.xlu1 %1606 }
 0x545   :  { %v1621_v31 = vsel %vm673_vm3, %v1603_v47, %v1607_v48 }
 0x546   :  { %v1611_v53 = vpop.permute.xlu0 %1610  ;;  %v1628_v57 = vmul.f32 %v1621_v31, %v3197_v6  ;;  %v1624_v31 = vmul.f32 %v3835_v42, %v3197_v6  ;;  %v1586_v6 = vsel %vm617_vm4, %v3854_v1, %v3869_v15 }
 0x547   :  { %v1619_v12 = vsel %vm673_vm3, %v1607_v48, %v1611_v53  ;;  %v1616_v48 = vsel %vm673_vm3, %v1609_v8, %v1613_v22  ;;  %v1593_v8 = vmul.f32 %v1586_v6, %v3253_v17  ;;  %v1584_v22 = vsel %vm617_vm4, %v3869_v15, %v3874_v41 }
 0x548   :  { %v1629_v35 = vmul.f32 %v1619_v12, %v3202_v9  ;;  %v1615_v2 = vpop.permute.xlu1 %1614  ;;  %v1626_v9 = vmul.f32 %v1616_v48, %v3221_v26 }
 0x549   :  { %v1617_v13 = vsel %vm673_vm3, %v1611_v53, %v1615_v2  ;;  %v1623_v0 = vsel %vm673_vm3, %v1615_v2, %v1603_v47 }
 0x54a   :  { %v1630_v12 = vmul.f32 %v1617_v13, %v3221_v26  ;;  %v1631_v49 = vmul.f32 %v1623_v0, %v3225_v36  ;;  %1680 = vmatprep.subr.mxu0 %v1629_v35  ;;  %v1571_v16 = vpop.permute.xlu0 %1570  ;;  %v1590_v26 = vsel %vm617_vm4, %v3874_v41, %v3852_v24 }
 0x54b   :  { %1681 = vmatpush1.msra.mxu0 %v1628_v57  ;;  %v1595_v35 = vmul.f32 %v1590_v26, %v3274_v4 }
 0x54c   :  { %v1575_v53 = vpop.permute.xlu1 %1574  ;;  %1682 = vmatprep.subr.mxu0 %v1625_v33  ;;  %1757 = vmatprep.subr.mxu1 %v1631_v49 }
 0x54d   :  { %1683 = vmatpush1.msra.mxu0 %v1624_v31  ;;  %1758 = vmatpush1.msra.mxu1 %v1630_v12  ;;  %v1589_v13 = vsel %vm617_vm4, %v1571_v16, %v1575_v53 }
 0x54e   :  { %1759 = vmatprep.subr.mxu1 %v1627_v55  ;;  %v1579_v46 = vpop.permute.xlu0 %1578  ;;  %v1596_v2 = vmul.f32 %v1589_v13, %v3249_v62  ;;  %v1554_v62 = vsel %vm561_vm5, %v3881_v54, %v3889_v52  ;;  %v1552_v55 = vsel %vm561_vm5, %v3889_v52, %v3891_v30  ;;  %v1560_v13 = vmul.f32 %v3887_v21, %v3299_v19 }
 0x54f   :  { %v1587_v36 = vsel %vm617_vm4, %v1575_v53, %v1579_v46  ;;  %1760 = vmatpush1.msra.mxu1 %v1626_v9  ;;  %v1561_v31 = vmul.f32 %v1554_v62, %v3302_v5  ;;  %v4338_v62 = vld [vmem:[#allocation29_spill] sm:$0xff] }
 0x550   :  { %v1597_v57 = vmul.f32 %v1587_v36, %v3253_v17  ;;  %v1583_v47 = vpop.permute.xlu1 %1582  ;;  %v1594_v17 = vmul.f32 %v1584_v22, %v3271_v11  ;;  %v4334_v22 = vld [vmem:[#allocation23_spill] sm:$0xff] }
 0x551   :  { %v1585_v49 = vsel %vm617_vm4, %v1579_v46, %v1583_v47  ;;  %v1591_v42 = vsel %vm617_vm4, %v1583_v47, %v1571_v16  ;;  %v1530_v47 = vmul.f32 %v3905_v14, %v3363_v18 }
 0x552   :  { %v1598_v1 = vmul.f32 %v1585_v49, %v3271_v11  ;;  %v1599_v0 = vmul.f32 %v1591_v42, %v3274_v4  ;;  %1684 = vmatprep.subr.mxu0 %v1597_v57  ;;  %v1539_v24 = vpop.permute.xlu0 %1538  ;;  %v1558_v11 = vsel %vm561_vm5, %v3891_v30, %v3879_v20  ;;  %v4333_v49 = vld [vmem:[#allocation6_spill] sm:$0xff] }
 0x553   :  { %1685 = vmatpush1.msra.mxu0 %v1596_v2  ;;  %v1563_v46 = vmul.f32 %v1558_v11, %v3325_v25 }
 0x554   :  { %v1543_v16 = vpop.permute.xlu1 %1542  ;;  %1686 = vmatprep.subr.mxu0 %v1593_v8  ;;  %1761 = vmatprep.subr.mxu1 %v1599_v0 }
 0x555   :  { %1687 = vmatpush1.msra.mxu0 %v1592_v45  ;;  %1762 = vmatpush1.msra.mxu1 %v1598_v1  ;;  %v1557_v15 = vsel %vm561_vm5, %v1539_v24, %v1543_v16  ;;  %v1497_v1 = vmul.f32 %v4334_v22, %v3411_v39  ;;  %v4336_v45 = vld [vmem:[#allocation24_spill] sm:$0xff] }
 0x556   :  { %1763 = vmatprep.subr.mxu1 %v1595_v35  ;;  %v1547_v41 = vpop.permute.xlu0 %1546  ;;  %v1564_v48 = vmul.f32 %v1557_v15, %v3299_v19  ;;  %v1520_v19 = vsel %vm505_vm6, %v3900_v3, %v3907_v59 }
 0x557   :  { %v1555_v4 = vsel %vm561_vm5, %v1543_v16, %v1547_v41  ;;  %1764 = vmatpush1.msra.mxu1 %v1594_v17  ;;  %v4337_v17 = vld [vmem:[#allocation7_spill] sm:$0xff] }
 0x558   :  { %v1565_v50 = vmul.f32 %v1555_v4, %v3302_v5  ;;  %v1551_v33 = vpop.permute.xlu1 %1550  ;;  %v1562_v5 = vmul.f32 %v1552_v55, %v3322_v60  ;;  %v4339_v4 = vld [vmem:[#allocation27_spill] sm:$0xff]  ;;  %v4342_v55 = vld [vmem:[#allocation10_spill] sm:$0xff] }
 0x559   :  { %v1553_v12 = vsel %vm561_vm5, %v1547_v41, %v1551_v33  ;;  %v1559_v54 = vsel %vm561_vm5, %v1551_v33, %v1539_v24  ;;  %v4340_v33 = vld [vmem:[#allocation25_spill] sm:$0xff] }
 0x55a   :  { %v1566_v53 = vmul.f32 %v1553_v12, %v3322_v60  ;;  %v1567_v9 = vmul.f32 %v1559_v54, %v3325_v25  ;;  %1688 = vmatprep.subr.mxu0 %v1565_v50  ;;  %v1507_v20 = vpop.permute.xlu0 %1506  ;;  %v1456_v50 = vsel %vm393_vm8, %v4339_v4, %v4338_v62  ;;  %v1462_v11 = vsel %vm393_vm8, %v4338_v62, %v4340_v33  ;;  %v4341_v54 = vld [vmem:[#allocation9_spill] sm:$0xff]  ;;  %v4360_v62 = vld [vmem:[#allocation18_spill] sm:$0xff] }
 0x55b   :  { %1689 = vmatpush1.msra.mxu0 %v1564_v48 }
 0x55c   :  { %v1511_v6 = vpop.permute.xlu1 %1510  ;;  %1690 = vmatprep.subr.mxu0 %v1561_v31  ;;  %1765 = vmatprep.subr.mxu1 %v1567_v9 }
 0x55d   :  { %v1525_v52 = vsel %vm505_vm6, %v1507_v20, %v1511_v6  ;;  %1691 = vmatpush1.msra.mxu0 %v1560_v13  ;;  %1766 = vmatpush1.msra.mxu1 %v1566_v53 }
 0x55e   :  { %1692 = vmatprep.subr.mxu0 %v3770_v38  ;;  %1767 = vmatprep.subr.mxu1 %v1563_v46  ;;  %v1515_v30 = vpop.permute.xlu0 %1514  ;;  %v1533_v25 = vmul.f32 %v1525_v52, %v3351_v23  ;;  %v4344_v46 = vld [vmem:[#allocation8_spill] sm:$0xff]  ;;  %v1467_v52 = vmul.f32 %v1456_v50, %v4342_v55 }
 0x55f   :  { %1693 = vmatpush1.msra.mxu0 %v3766_v58  ;;  %1768 = vmatpush1.msra.mxu1 %v1562_v5  ;;  %v1523_v60 = vsel %vm505_vm6, %v1511_v6, %v1515_v30  ;;  %v1526_v58 = vsel %vm505_vm6, %v3907_v59, %v3893_v51  ;;  %v1529_v59 = vmul.f32 %v3898_v29, %v3351_v23 }
 0x560   :  { %v1519_v21 = vpop.permute.xlu1 %1518  ;;  %1694 = vmatprep.subr.mxu0 %v3702_v32  ;;  %1769 = vmatprep.subr.mxu1 %v3778_v10  ;;  %v1534_v51 = vmul.f32 %v1523_v60, %v3363_v18  ;;  %v1528_v57 = vmul.f32 %v1526_v58, %v3366_v27  ;;  %v1488_v18 = vsel %vm449_vm7, %v3916_v40, %v3923_v56  ;;  %v4335_v40 = vld [vmem:[#allocation5_spill] sm:$0xff] }
 0x561   :  { %v1521_v38 = vsel %vm505_vm6, %v1515_v30, %v1519_v21  ;;  %v1527_v3 = vsel %vm505_vm6, %v1519_v21, %v1507_v20  ;;  %1695 = vmatpush1.msra.mxu0 %v3700_v61  ;;  %1770 = vmatpush1.msra.mxu1 %v3774_v28  ;;  %v1531_v61 = vmul.f32 %v1520_v19, %v3376_v44  ;;  %v4343_v20 = vld [vmem:[#allocation26_spill] sm:$0xff]  ;;  %v4345_v19 = vld [vmem:[#allocation28_spill] sm:$0xff]  ;;  %v4346_v21 = vld [vmem:[#allocation11_spill] sm:$0xff] }
 0x562   :  { %v1532_v36 = vmul.f32 %v1527_v3, %v3366_v27  ;;  %v1535_v32 = vmul.f32 %v1521_v38, %v3376_v44  ;;  %1696 = vmatprep.subr.mxu0 %v1533_v25  ;;  %1771 = vmatprep.subr.mxu1 %v3710_v43  ;;  %v1475_v10 = vpop.permute.xlu0 %1474  ;;  %v1494_v29 = vsel %vm449_vm7, %v3923_v56, %v3909_v34 }
 0x563   :  { %1772 = vmatpush1.msra.mxu1 %v3708_v7  ;;  %v1496_v24 = vmul.f32 %v1494_v29, %v3427_v37  ;;  %v1499_v56 = vmul.f32 %v1488_v18, %v4333_v49  ;;  %v1498_v35 = vmul.f32 %v4336_v45, %v4335_v40  ;;  %v1465_v13 = vmul.f32 %v4343_v20, %v4337_v17  ;;  %v4353_v29 = vld [vmem:[#allocation12_spill] sm:$0xff] }
 0x564   :  { %v1479_v28 = vpop.permute.xlu1 %1478  ;;  %1697 = vmatpush1.msra.mxu0 %v1532_v36  ;;  %1773 = vmatprep.subr.mxu1 %v1535_v32  ;;  %v1464_v5 = vmul.f32 %v1462_v11, %v4341_v54  ;;  %v1466_v25 = vmul.f32 %v4345_v19, %v4344_v46  ;;  %v4347_v32 = vld [vmem:[#allocation34_spill] sm:$0xff]  ;;  %v1166_v20 = vld [vmem:[%s4253_s10 + $0x18] sm:$0xf] }
 0x565   :  { %v1493_v43 = vsel %vm449_vm7, %v1475_v10, %v1479_v28  ;;  %1698 = vmatprep.subr.mxu0 %v1529_v59  ;;  %1774 = vmatpush1.msra.mxu1 %v1534_v51  ;;  %v4349_v51 = vld [vmem:[#allocation30_spill] sm:$0xff] }
 0x566   :  { %v1501_v23 = vmul.f32 %v1493_v43, %v3411_v39  ;;  %1699 = vmatpush1.msra.mxu0 %v1528_v57  ;;  %1775 = vmatprep.subr.mxu1 %v1531_v61  ;;  %v1483_v7 = vpop.permute.xlu0 %1482  ;;  %v1430_v57 = vsel %vm338_vm9, %v4347_v32, %v4349_v51 }
 0x567   :  { %1776 = vmatpush1.msra.mxu1 %v1530_v47  ;;  %v1491_v27 = vsel %vm449_vm7, %v1479_v28, %v1483_v7  ;;  %v4350_v47 = vld [vmem:[#allocation13_spill] sm:$0xff] }
 0x568   :  { %v1487_v44 = vpop.permute.xlu1 %1486  ;;  %1700 = vmatprep.subr.mxu0 %v1501_v23  ;;  %v1502_v0 = vmul.f32 %v1491_v27, %v4335_v40  ;;  %v4351_v23 = vld [vmem:[#allocation14_spill] sm:$0xff] }
 0x569   :  { %v1489_v14 = vsel %vm449_vm7, %v1483_v7, %v1487_v44  ;;  %v1495_v26 = vsel %vm449_vm7, %v1487_v44, %v1475_v10  ;;  %v4348_v10 = vld [vmem:[#allocation32_spill] sm:$0xff]  ;;  %v4352_v44 = vld [vmem:[#allocation31_spill] sm:$0xff] }
 0x56a   :  { %v1500_v2 = vmul.f32 %v1495_v26, %v3427_v37  ;;  %v1503_v42 = vmul.f32 %v1489_v14, %v4333_v49  ;;  %v1443_v8 = vpop.permute.xlu0 %1442  ;;  %v1424_v59 = vsel %vm338_vm9, %v4348_v10, %v4347_v32  ;;  %v1433_v18 = vmul.f32 %v4352_v44, %v4346_v21 }
 0x56b   :  { %v1432_v26 = vmul.f32 %v1430_v57, %v4350_v47 }
 0x56c   :  { %v1447_v34 = vpop.permute.xlu1 %1446  ;;  %1701 = vmatpush1.msra.mxu0 %v1500_v2  ;;  %1777 = vmatprep.subr.mxu1 %v1503_v42  ;;  %v1435_v2 = vmul.f32 %v1424_v59, %v4351_v23  ;;  %v4354_v42 = vld [vmem:[#allocation33_spill] sm:$0xff] }
 0x56d   :  { %v1461_v16 = vsel %vm393_vm8, %v1443_v8, %v1447_v34  ;;  %1702 = vmatprep.subr.mxu0 %v1497_v1  ;;  %1778 = vmatpush1.msra.mxu1 %v1502_v0  ;;  %v4355_v0 = vld [vmem:[#allocation16_spill] sm:$0xff] }
 0x56e   :  { %v1469_v15 = vmul.f32 %v1461_v16, %v4337_v17  ;;  %1703 = vmatpush1.msra.mxu0 %v1496_v24  ;;  %1779 = vmatprep.subr.mxu1 %v1499_v56  ;;  %v1451_v39 = vpop.permute.xlu0 %1450  ;;  %v4357_v17 = vld [vmem:[#allocation36_spill] sm:$0xff] }
 0x56f   :  { %1780 = vmatpush1.msra.mxu1 %v1498_v35  ;;  %v1459_v37 = vsel %vm393_vm8, %v1447_v34, %v1451_v39  ;;  %v4356_v34 = vld [vmem:[#allocation15_spill] sm:$0xff] }
 0x570   :  { %v1455_v41 = vpop.permute.xlu1 %1454  ;;  %1704 = vmatprep.subr.mxu0 %v1469_v15  ;;  %v1470_v6 = vmul.f32 %v1459_v37, %v4344_v46  ;;  %v4358_v15 = vld [vmem:[#allocation35_spill] sm:$0xff]  ;;  %v4359_v37 = vld [vmem:[#allocation17_spill] sm:$0xff] }
 0x571   :  { %v1457_v48 = vsel %vm393_vm8, %v1451_v39, %v1455_v41  ;;  %v1463_v12 = vsel %vm393_vm8, %v1455_v41, %v1443_v8  ;;  %v1434_v8 = vmul.f32 %v4354_v42, %v4353_v29  ;;  %v1652_v39 = vsel %vm729_vm10, %v4358_v15, %v4357_v17 }
 0x572   :  { %v1468_v31 = vmul.f32 %v1463_v12, %v4341_v54  ;;  %v1471_v53 = vmul.f32 %v1457_v48, %v4342_v55  ;;  %v1411_v9 = vpop.permute.xlu0 %1410  ;;  %v1656_v12 = vmul.f32 %v1652_v39, %v4356_v34  ;;  %v1163_v55 = vld [vmem:[%s4253_s10] sm:$0xff] }
 0x574   :  { %v1415_v30 = vpop.permute.xlu1 %1414  ;;  %1705 = vmatpush1.msra.mxu0 %v1468_v31  ;;  %1781 = vmatprep.subr.mxu1 %v1471_v53 }
 0x575   :  { %v1429_v60 = vsel %vm338_vm9, %v1411_v9, %v1415_v30  ;;  %1706 = vmatprep.subr.mxu0 %v1465_v13  ;;  %1782 = vmatpush1.msra.mxu1 %v1470_v6  ;;  %v4361_v13 = vmov 0.0  }
 0x576   :  { %v1437_v58 = vmul.f32 %v1429_v60, %v4346_v21  ;;  %1707 = vmatpush1.msra.mxu0 %v1464_v5  ;;  %1783 = vmatprep.subr.mxu1 %v1467_v52  ;;  %v1419_v38 = vpop.permute.xlu0 %1418 }
 0x577   :  { %1784 = vmatpush1.msra.mxu1 %v1466_v25  ;;  %v1427_v3 = vsel %vm338_vm9, %v1415_v30, %v1419_v38 }
 0x578   :  { %v1423_v36 = vpop.permute.xlu1 %1422  ;;  %1708 = vmatprep.subr.mxu0 %v1437_v58  ;;  %v1438_v14 = vmul.f32 %v1427_v3, %v4353_v29 }
 0x579   :  { %v1425_v61 = vsel %vm338_vm9, %v1419_v38, %v1423_v36  ;;  %v1431_v28 = vsel %vm338_vm9, %v1423_v36, %v1411_v9 }
 0x57a   :  { %v1436_v43 = vmul.f32 %v1431_v28, %v4350_v47  ;;  %v1439_v7 = vmul.f32 %v1425_v61, %v4351_v23  ;;  %v1635_v27 = vpop.permute.xlu0 %1634 }
 0x57c   :  { %v1639_v49 = vpop.permute.xlu1 %1638  ;;  %1709 = vmatpush1.msra.mxu0 %v1436_v43  ;;  %1785 = vmatprep.subr.mxu1 %v1439_v7 }
 0x57d   :  { %1710 = vmatprep.subr.mxu0 %v1433_v18  ;;  %1786 = vmatpush1.msra.mxu1 %v1438_v14  ;;  %v1653_v22 = vsel %vm729_vm10, %v1635_v27, %v1639_v49 }
 0x57e   :  { %1711 = vmatpush1.msra.mxu0 %v1432_v26  ;;  %1787 = vmatprep.subr.mxu1 %v1435_v2  ;;  %v1643_v1 = vpop.permute.xlu0 %1642  ;;  %v1660_v45 = vmul.f32 %v1653_v22, %v4356_v34 }
 0x57f   :  { %v1651_v40 = vsel %vm729_vm10, %v1639_v49, %v1643_v1  ;;  %1788 = vmatpush1.msra.mxu1 %v1434_v8 }
 0x580   :  { %v1661_v24 = vmul.f32 %v1651_v40, %v4355_v0  ;;  %v1647_v56 = vpop.permute.xlu1 %1646 }
 0x581   :  { %v1649_v35 = vsel %vm729_vm10, %v1643_v1, %v1647_v56  ;;  %v1655_v16 = vsel %vm729_vm10, %v1647_v56, %v1635_v27 }
 0x582   :  { %v1662_v41 = vmul.f32 %v1649_v35, %v4359_v37  ;;  %v1663_v4 = vmul.f32 %v1655_v16, %v4360_v62  ;;  %1740 = vmatprep.subr.mxu0 %v1661_v24  ;;  %v1641_v50 = vpop.permute.xlu0 %1640 }
 0x583   :  { %v1650_v33 = vsel %vm729_vm10, %v4357_v17, %v1641_v50  ;;  %1741 = vmatpush2.msra.mxu0 %v1660_v45 }
 0x584   :  { %v1657_v11 = vmul.f32 %v1650_v33, %v4355_v0  ;;  %v1645_v48 = vpop.permute.xlu1 %1644  ;;  %1817 = vmatprep.subr.mxu1 %v1663_v4 }
 0x585   :  { %v1648_v54 = vsel %vm729_vm10, %v1641_v50, %v1645_v48  ;;  %v1654_v31 = vsel %vm729_vm10, %v1645_v48, %v4358_v15  ;;  %1818 = vmatpush2.msra.mxu1 %v1662_v41 }
 0x586   :  { %v1658_v53 = vmul.f32 %v1648_v54, %v4359_v37  ;;  %v1659_v9 = vmul.f32 %v1654_v31, %v4360_v62  ;;  %1742 = vmatprep.subr.mxu0 %v1657_v11 }
 0x587   :  { %1743 = vmatpush2.msra.mxu0 %v1656_v12 }
 0x588   :  { %1745 = vmatmul.mubr.f32.vlgmr.msra.gmra.mxu0 %v1163_v55  ;;  %1819 = vmatprep.subr.mxu1 %v1659_v9 }
 0x589   :  { %1820 = vmatpush2.msra.mxu1 %v1658_v53  ;;  %2514 = vmatprep.mubr.msk.f32.mxu0 %vm779_vm2, %v1166_v20 }
 0x58a   :  { %1822 = vmatmul.mubr.f32.vlgmr.msra.gmra.mxu1 %v1163_v55 }
 0x58b   :  { %2516 = vmatprep.mubr.msk.f32.mxu1 %vm779_vm2, %v1166_v20 }
 0x58c   :  { %1751 = vmatmul.mubr.f32.gmra.mxu0 %v1165_v63 }
 0x58d   :  { %1969 = vmatprep.mubr.f32.mxu0 %v4361_v13 }
 0x58e   :  { %1828 = vmatmul.mubr.f32.gmra.mxu1 %v1165_v63 }
 0x58f   :  { %2040 = vmatprep.mubr.f32.mxu1 %v4361_v13  ;;  %v1672_v19 = vpop.permute.xlu0 %1671 }
 0x591   :  { %v1667_v46 = vpop.permute.xlu1 %1666 }
 0x648   :  { %v1746_v6 = vpop.f32.mrf.mxu0 }
 0x649   :  { %v4196_v5 = vadd.f32 %v1746_v6, %v1667_v46 }
 0x64a   :  { %v1748_v52 = vpop.f32.mrf.mxu0  ;;  %v1823_v30 = vpop.f32.mrf.mxu1 }
 0x64b   :  { %v1834_v25 = vsub.f32 0.0, %v4196_v5  ;;  %v4199_v60 = vadd.f32 %v1748_v52, %v1667_v46  ;;  %v4201_v21 = vadd.f32 %v1823_v30, %v1667_v46 }
 0x64c   :  { %v1752_v58 = vpop.f32.mrf.mxu0  ;;  %v1825_v38 = vpop.f32.mrf.mxu1 }
 0x64d   :  { %v1842_v3 = vmin.f32 %v1834_v25, 30.0  ;;  %v1835_v36 = vsub.f32 0.0, %v4199_v60  ;;  %v1836_v32 = vsub.f32 0.0, %v4201_v21  ;;  %v4205_v10 = vadd.f32 %v1752_v58, %v1672_v19 }
 0x64e   :  { %v4207_v59 = vadd.f32 %v1825_v38, %v1667_v46  ;;  %v1754_v51 = vpop.f32.mrf.mxu0  ;;  %v1829_v57 = vpop.f32.mrf.mxu1 }
 0x64f   :  { %v1850_v61 = vmul.f32 1.442695, %v1842_v3  ;;  %v1843_v28 = vmin.f32 %v1835_v36, 30.0  ;;  %v1844_v47 = vmin.f32 %v1836_v32, 30.0  ;;  %v1838_v43 = vsub.f32 0.0, %v4205_v10  ;;  %v2624_v36 = vld [vmem:[#allocation2 + $0x78] sm:$0xff]  }
 0x650   :  { %v1837_v23 = vsub.f32 0.0, %v4207_v59  ;;  %v1755_v7 = vadd.f32 %v1754_v51, %v1672_v19  ;;  %v4211_v27 = vadd.f32 %v1829_v57, %v1672_v19  ;;  %v1831_v44 = vpop.f32.mrf.mxu1  ;;  %v1169_v3 = vld [vmem:[%s4255_s12] sm:$0x3f]  ;;  %v2627_v57 = vld [vmem:[#allocation2 + $0xb8] sm:$0xff]  }
 0x651   :  { %2752 = vpow2.f32 %v1850_v61  ;;  %v1852_v18 = vmul.f32 1.442695, %v1843_v28  ;;  %v1846_v29 = vmin.f32 %v1838_v43, 30.0  ;;  %v1832_v49 = vadd.f32 %v1831_v44, %v1672_v19  ;;  %v2628_v61 = vld [vmem:[#allocation2 + $0x70] sm:$0xff]   ;;  %v2638_v44 = vld [vmem:[#allocation2 + $0xe0] sm:$0xff]  }
 0x652   :  { %v1845_v14 = vmin.f32 %v1837_v23, 30.0  ;;  %v1839_v26 = vsub.f32 0.0, %v1755_v7  ;;  %v1840_v2 = vsub.f32 0.0, %v4211_v27  ;;  %v1854_v42 = vmul.f32 1.442695, %v1844_v47  ;;  %v2630_v28 = vld [vmem:[#allocation2 + $0xf0] sm:$0xff]  }
 0x653   :  { %2754 = vpow2.f32 %v1852_v18  ;;  %v1858_v8 = vmul.f32 1.442695, %v1846_v29  ;;  %v1841_v0 = vsub.f32 0.0, %v1832_v49  ;;  %v2629_v47 = vld [vmem:[#allocation2 + $0x30] sm:$0xff]   ;;  %v2633_v23 = vld [vmem:[#allocation2 + $0x28] sm:$0xff]   ;;  %v2637_v18 = vld [vmem:[#allocation2 + $0x20] sm:$0xff]  }
 0x654   :  { %v1856_v22 = vmul.f32 1.442695, %v1845_v14  ;;  %v1847_v1 = vmin.f32 %v1839_v26, 30.0  ;;  %v1848_v40 = vmin.f32 %v1840_v2, 30.0  ;;  %v2631_v43 = vld [vmem:[#allocation2 + $0xb0] sm:$0xff]   ;;  %v2640_v29 = vld [vmem:[#allocation2 + $0x58] sm:$0xff]  }
 0x655   :  { %2756 = vpow2.f32 %v1858_v8  ;;  %v1849_v34 = vmin.f32 %v1841_v0, 30.0  ;;  %v2639_v14 = vld [vmem:[#allocation2 + $0xa0] sm:$0xff]   ;;  %v2642_v26 = vld [vmem:[#allocation2 + $0xd8] sm:$0xff]   ;;  %v2646_v8 = vld [vmem:[#allocation2 + $0xd0] sm:$0xff]  }
 0x656   :  { %2758 = vpow2.f32 %v1856_v22  ;;  %v1860_v24 = vmul.f32 1.442695, %v1847_v1  ;;  %v1862_v56 = vmul.f32 1.442695, %v1848_v40  ;;  %v2641_v2 = vld [vmem:[#allocation2 + $0x18] sm:$0xff]   ;;  %v2645_v22 = vld [vmem:[#allocation2 + $0x10] sm:$0xff]  }
 0x657   :  { %2760 = vpow2.f32 %v1854_v42  ;;  %v1864_v45 = vmul.f32 1.442695, %v1849_v34  ;;  %v2643_v42 = vld [vmem:[#allocation2 + $0x98] sm:$0xff]   ;;  %v2647_v1 = vld [vmem:[#allocation2 + $0x90] sm:$0xff]   ;;  %v2648_v40 = vld [vmem:[#allocation2 + $0x48] sm:$0xff]  }
 0x658   :  { %2762 = vpow2.f32 %v1860_v24  ;;  %v2649_v0 = vld [vmem:[#allocation2 + $0x8] sm:$0xff]   ;;  %v2652_v34 = vld [vmem:[#allocation2 + $0x40] sm:$0xff]  }
 0x659   :  { %2764 = vpow2.f32 %v1862_v56  ;;  %v2650_v24 = vld [vmem:[#allocation2 + $0xc8] sm:$0xff]  }
 0x65a   :  { %2766 = vpow2.f32 %v1864_v45  ;;  %v2651_v56 = vld [vmem:[#allocation2 + $0x88] sm:$0xff]   ;;  %v2653_v45 = vld [vmem:[#allocation2] sm:$0xff]  }
 0x65e   :  { %v2753_v35 = vpop.eup %2752 }
 0x65f   :  { %v1866_v17 = vadd.f32 1.0, %v2753_v35  ;;  %v2654_v35 = vld [vmem:[#allocation2 + $0xc0] sm:$0xff]  }
 0x660   :  { %v2755_v16 = vpop.eup %2754 }
 0x661   :  { %v1867_v39 = vadd.f32 1.0, %v2755_v16  ;;  %2768 = vrcp.f32 %v1866_v17  ;;  %v2655_v16 = vld [vmem:[#allocation2 + $0x80] sm:$0xff]  }
 0x662   :  { %v2757_v15 = vpop.eup %2756 }
 0x663   :  { %v2759_v37 = vpop.eup %2758  ;;  %v1870_v41 = vadd.f32 1.0, %v2757_v15  ;;  %2770 = vrcp.f32 %v1867_v39  ;;  %v4362_v15 = vld [vmem:[#allocation19_spill] sm:$0xff] }
 0x664   :  { %v2761_v62 = vpop.eup %2760  ;;  %v1869_v50 = vadd.f32 1.0, %v2759_v37 }
 0x665   :  { %v2763_v4 = vpop.eup %2762  ;;  %2772 = vrcp.f32 %v1870_v41  ;;  %v1868_v54 = vadd.f32 1.0, %v2761_v62  ;;  %v4363_v41 = vld [vmem:[#allocation20_spill] sm:$0xff] }
 0x666   :  { %v2765_v33 = vpop.eup %2764  ;;  %v1871_v11 = vadd.f32 1.0, %v2763_v4 }
 0x667   :  { %v1872_v48 = vadd.f32 1.0, %v2765_v33  ;;  %v2767_v12 = vpop.eup %2766  ;;  %v4364_v33 = vld [vmem:[#allocation22_spill] sm:$0xff] }
 0x668   :  { %2774 = vrcp.f32 %v1871_v11  ;;  %v1873_v31 = vadd.f32 1.0, %v2767_v12 }
 0x669   :  { %2776 = vrcp.f32 %v1869_v50 }
 0x66a   :  { %2778 = vrcp.f32 %v1872_v48 }
 0x66b   :  { %2780 = vrcp.f32 %v1873_v31 }
 0x66c   :  { %2782 = vrcp.f32 %v1868_v54  ;;  %v4365_v54 = vld [vmem:[#allocation21_spill] sm:$0xff] }
 0x66e   :  { %v2769_v55 = vpop.eup %2768 }
 0x66f   :  { %v1882_v58 = vmul.f32 %v2769_v55, %v4196_v5 }
 0x670   :  { %v2771_v53 = vpop.eup %2770 }
 0x671   :  { %v1883_v19 = vmul.f32 %v2771_v53, %v4199_v60  ;;  %v2626_v60 = vld [vmem:[#allocation2 + $0xf8] sm:$0xff]  }
 0x672   :  { %v2773_v9 = vpop.eup %2772 }
 0x673   :  { %v1886_v52 = vmul.f32 %v2773_v9, %v4205_v10  ;;  %v2625_v10 = vld [vmem:[#allocation2 + $0x38] sm:$0xff]  }
 0x675   :  { %v2775_v20 = vpop.eup %2774 }
 0x676   :  { %v2777_v63 = vpop.eup %2776  ;;  %v1887_v46 = vmul.f32 %v2775_v20, %v1755_v7  ;;  %v2636_v7 = vld [vmem:[#allocation2 + $0x60] sm:$0xff]  }
 0x677   :  { %v2779_v6 = vpop.eup %2778  ;;  %v1885_v51 = vmul.f32 %v2777_v63, %v4207_v59  ;;  %v2632_v59 = vld [vmem:[#allocation2 + $0x68] sm:$0xff]  }
 0x678   :  { %v2781_v30 = vpop.eup %2780  ;;  %2517 = vmatprep.subr.msk.mxu0 %vm1000_vm11, %v1887_v46  ;;  %v1888_v32 = vmul.f32 %v2779_v6, %v4211_v27  ;;  %v2635_v27 = vld [vmem:[#allocation2 + $0xa8] sm:$0xff]  }
 0x679   :  { %v2783_v25 = vpop.eup %2782  ;;  %v1889_v38 = vmul.f32 %v2781_v30, %v1832_v49  ;;  %2518 = vmatpush1.msk.msra.mxu0 %vm1000_vm11, %v1886_v52  ;;  %v2644_v49 = vld [vmem:[#allocation2 + $0x50] sm:$0xff]  }
 0x67a   :  { %1935 = vmatprep.subr.mxu0 %v1883_v19  ;;  %v1884_v5 = vmul.f32 %v2783_v25, %v4201_v21  ;;  %v2634_v21 = vld [vmem:[#allocation2 + $0xe8] sm:$0xff]  }
 0x67b   :  { %2520 = vmatprep.subr.msk.mxu1 %vm1000_vm11, %v1889_v38  ;;  %1936 = vmatpush1.msra.mxu0 %v1882_v58  ;;  %v2391_v38 = vld [vmem:[%s4256_s13] sm:$0x3f] }
 0x67c   :  { %2521 = vmatpush1.msk.msra.mxu1 %vm1000_vm11, %v1888_v32  ;;  %2519 = vmatmul.mubr.msk.f32.vlgmr.msra.gmra.mxu0 %vm996_vm12, %v1169_v3 }
 0x67d   :  { %2006 = vmatprep.subr.mxu1 %v1885_v51  ;;  %2557 = vmatprep.subr.bf16.mxu0 %v2624_v36 }
 0x67e   :  { %2007 = vmatpush1.msra.mxu1 %v1884_v5  ;;  %2558 = vmatpush3.bf16.msra.mxu0 %v2625_v10 }
 0x67f   :  { %2522 = vmatmul.mubr.msk.f32.vlgmr.msra.gmra.mxu1 %vm996_vm12, %v1169_v3  ;;  %2579 = vmatprep.subr.bf16.mxu1 %v2626_v60 }
 0x680   :  { %2580 = vmatpush3.bf16.msra.mxu1 %v2627_v57  ;;  %2559 = vmatprep.subr.bf16.mxu0 %v2628_v61 }
 0x681   :  { %2581 = vmatprep.subr.bf16.mxu1 %v2630_v28 }
 0x682   :  { %2560 = vmatpush3.bf16.msra.mxu0 %v2629_v47 }
 0x683   :  { %2561 = vmatprep.subr.bf16.mxu0 %v2632_v59 }
 0x684   :  { %2582 = vmatpush3.bf16.msra.mxu1 %v2631_v43 }
 0x685   :  { %2583 = vmatprep.subr.bf16.mxu1 %v2634_v21 }
 0x686   :  { %2562 = vmatpush3.bf16.msra.mxu0 %v2633_v23 }
 0x687   :  { %2563 = vmatprep.subr.bf16.mxu0 %v2636_v7 }
 0x688   :  { %2584 = vmatpush3.bf16.msra.mxu1 %v2635_v27 }
 0x689   :  { %2585 = vmatprep.subr.bf16.mxu1 %v2638_v44 }
 0x68a   :  { %2564 = vmatpush3.bf16.msra.mxu0 %v2637_v18 }
 0x68b   :  { %2565 = vmatprep.subr.bf16.mxu0 %v2640_v29 }
 0x68c   :  { %2586 = vmatpush3.bf16.msra.mxu1 %v2639_v14 }
 0x68d   :  { %2587 = vmatprep.subr.bf16.mxu1 %v2642_v26 }
 0x68e   :  { %2566 = vmatpush3.bf16.msra.mxu0 %v2641_v2 }
 0x68f   :  { %2567 = vmatprep.subr.bf16.mxu0 %v2644_v49 }
 0x690   :  { %2588 = vmatpush3.bf16.msra.mxu1 %v2643_v42 }
 0x691   :  { %2589 = vmatprep.subr.bf16.mxu1 %v2646_v8 }
 0x692   :  { %2568 = vmatpush3.bf16.msra.mxu0 %v2645_v22 }
 0x693   :  { %2569 = vmatprep.subr.bf16.mxu0 %v2648_v40 }
 0x694   :  { %2590 = vmatpush3.bf16.msra.mxu1 %v2647_v1 }
 0x695   :  { %2591 = vmatprep.subr.bf16.mxu1 %v2650_v24 }
 0x696   :  { %2570 = vmatpush3.bf16.msra.mxu0 %v2649_v0 }
 0x697   :  { %2571 = vmatprep.subr.bf16.mxu0 %v2652_v34 }
 0x698   :  { %2592 = vmatpush3.bf16.msra.mxu1 %v2651_v56 }
 0x699   :  { %2593 = vmatprep.subr.bf16.mxu1 %v2654_v35 }
 0x69a   :  { %2572 = vmatpush3.bf16.msra.mxu0 %v2653_v45 }
 0x69b   :  { %2603 = vmatprep.subr.mxu0 %v4361_v13 }
 0x69c   :  { %2594 = vmatpush3.bf16.msra.mxu1 %v2655_v16 }
 0x73c   :  { %v1971_v17 = vpop.f32.mrf.mxu0 }
 0x73d   :  { %v2047_v39 = vadd.f32 %v1971_v17, %v4362_v15 }
 0x73e   :  { %v1973_v37 = vpop.f32.mrf.mxu0 }
 0x73f   :  { %v2048_v62 = vadd.f32 %v1973_v37, %v4363_v41  ;;  %v2042_v4 = vpop.f32.mrf.mxu1  ;;  %v2051_v12 = vpack.c.bf16 %v2047_v39, %v2047_v39 }
 0x740   :  { %v2049_v11 = vadd.f32 %v2042_v4, %v4364_v33 }
 0x741   :  { %v2052_v50 = vpack.c.bf16 %v2048_v62, %v2048_v62  ;;  %v2044_v48 = vpop.f32.mrf.mxu1 }
 0x742   :  { %v2050_v31 = vadd.f32 %v2044_v48, %v4365_v54  ;;  %v2053_v53 = vpack.c.bf16 %v2049_v11, %v2049_v11 }
 0x743   :  { %2343 = vmatprep.mubr.bf16.mxu0 %v2052_v50 }
 0x744   :  { %v2054_v55 = vpack.c.bf16 %v2050_v31, %v2050_v31  ;;  %2344 = vmatmul.mubr.bf16.vlgmr.msra.gmra.mxu0 %v2051_v12 }
 0x745   :  { %2605 = vmatprep.mubr.msk.f32.mxu0 %vm2823_vm13, %v4361_v13  ;;  %v2396_v13 = vpop.permute.xlu0 %2395 }
 0x746   :  { %2383 = vmatprep.mubr.bf16.mxu1 %v2054_v55 }
 0x747   :  { %2384 = vmatmul.mubr.bf16.vlgmr.msra.gmra.mxu1 %v2053_v53 }
 0x804   :  { %v2573_v9 = vpop.f32.mrf.mxu0 }
 0x806   :  { %v2574_v20 = vpop.f32.mrf.mxu0 }
 0x807   :  { %v2595_v63 = vpop.f32.mrf.mxu1  ;;  %v2575_v52 = vadd.f32 %v2574_v20, %v2573_v9 }
 0x808   :  { %v2576_v46 = vpop.f32.mrf.mxu0 }
 0x809   :  { %v2596_v6 = vpop.f32.mrf.mxu1 }
 0x80a   :  { %v2597_v30 = vadd.f32 %v2596_v6, %v2595_v63  ;;  %v2577_v19 = vpop.f32.mrf.mxu0 }
 0x80b   :  { %v2598_v25 = vpop.f32.mrf.mxu1 }
 0x80c   :  { %v2386_v58 = vadd.f32 %v2597_v30, %v2575_v52 }
 0x80d   :  { %v2599_v3 = vpop.f32.mrf.mxu1 }
 0x80e   :  { %2604 = vmatpush3.msk.msra.mxu0 %vm97_vm0, %v2386_v58 }
 0x80f   :  { %2606 = vmatmul.mubr.msk.f32.vlgmr.msra.gmra.mxu0 %vm90_vm1, %v2391_v38 }
 0x8cf   :  { %v2470_v36 = vpop.f32.mrf.mxu0 }
 0x8d0   :  { %v2471_v32 = vadd.f32 %v2470_v36, %v2396_v13 }
 0x8d1   :  { %v2607_v10 = vpop.f32.mrf.mxu0 }
 0x8d2   :  { %2474 = vst [vmem:[%s4258_s15] sm:$0x3f] %v2471_v32 }
 0x8d3   :  { %2479 = vsyncpa [#allocation3], 1 }

</bundles_post_ra>
